<compile_context>
chip_gen: v7x
topology: tpu7x:2x2x1
jax: 0.10.0
libtpu: 0.0.40
codegen_flags: <defaults>
</compile_context>

<pallas_src>
import functools

import numpy as np
import jax
import jax.numpy as jnp
from jax import lax
from jax.experimental import pallas as pl
from jax.experimental.pallas import tpu as pltpu


def _round_up(x, m):
    return ((x + m - 1) // m) * m


# ----------------------------------------------------------------------------
# Pallas kernel: one bidirectional LSTM layer (both directions, full sequence)
# ----------------------------------------------------------------------------
def _bilstm_layer_kernel(x_ref, m_ref, wih_ref, whh_ref, b_ref,
                         hseq_ref, hfin_ref, h_sc, c_sc, *, matmul_dtype):
    d = pl.program_id(0)                 # 0 = forward, 1 = backward (reversed time)
    T = x_ref.shape[0]                   # static
    Hp = h_sc.shape[-1]                  # static, multiple of 128

    # Weights resident in VMEM for the whole recurrence; load once, out of loop.
    wih = wih_ref[0].astype(matmul_dtype)      # (Din, 4*Hp)
    whh = whh_ref[0].astype(matmul_dtype)      # (Hp, 4*Hp)
    b = b_ref[0]                               # (1, 4*Hp)

    h_sc[...] = jnp.zeros_like(h_sc)
    c_sc[...] = jnp.zeros_like(c_sc)

    def step(s, carry):
        # forward walks t = 0..T-1; backward walks t = T-1..0 (no HBM reversal).
        t = jnp.where(d == 0, s, T - 1 - s)
        x_t = x_ref[t].astype(matmul_dtype)    # (Bp, Din)
        m_t = m_ref[t]                         # (Bp, 1)   1.0 where step is valid
        h_prev = h_sc[...]
        c_prev = c_sc[...]

        gates = (jnp.dot(x_t, wih, preferred_element_type=jnp.float32)
                 + jnp.dot(h_prev.astype(matmul_dtype), whh,
                           preferred_element_type=jnp.float32)
                 + b)                          # (Bp, 4*Hp)

        # Lane-aligned gate slices (Hp % 128 == 0); PyTorch gate order [i, f, g, o].
        i = jax.nn.sigmoid(gates[:, 0 * Hp:1 * Hp])
        f = jax.nn.sigmoid(gates[:, 1 * Hp:2 * Hp])
        g = jnp.tanh(gates[:, 2 * Hp:3 * Hp])
        o = jax.nn.sigmoid(gates[:, 3 * Hp:4 * Hp])

        c_new = f * c_prev + i * g
        h_new = o * jnp.tanh(c_new)

        valid = m_t > 0.0                      # pack_padded: freeze state at padding
        c_upd = jnp.where(valid, c_new, c_prev)
        h_upd = jnp.where(valid, h_new, h_prev)
        c_sc[...] = c_upd
        h_sc[...] = h_upd
        hseq_ref[t] = h_upd * m_t              # padded positions emit zeros (VMEM store)
        return carry

    lax.fori_loop(0, T, step, 0, unroll=True if T <= 32 else False)
    hfin_ref[0] = h_sc[...]                    # written once, after the last step


def bilstm_layer(x_tm, mask_tm, wih_all, whh_all, b_all, *, hidden_pad,
                 matmul_dtype=jnp.float32):
    """One bidirectional LSTM layer.

    x_tm:    (T, Bp, Din) f32 time-major activations (Bp multiple of 8)
    mask_tm: (T, Bp, 1)   f32 validity mask
    weights: stacked over direction: (2, Din, 4*Hp), (2, Hp, 4*Hp), (2, 1, 4*Hp)
    Returns hseq (T, Bp, 2*Hp)  [fwd in lanes [:Hp], bwd in lanes [Hp:]]
            hfin (2, Bp, Hp)    final hidden per direction.
    """
    T, Bp, Din = x_tm.shape
    Hp = hidden_pad
    kernel = functools.partial(_bilstm_layer_kernel, matmul_dtype=matmul_dtype)
    return pl.pallas_call(
        kernel,
        out_shape=(jax.ShapeDtypeStruct((T, Bp, 2 * Hp), jnp.float32),
                   jax.ShapeDtypeStruct((2, Bp, Hp), jnp.float32)),
        grid_spec=pltpu.PrefetchScalarGridSpec(
            num_scalar_prefetch=0,
            grid=(2,),                                       # direction axis only
            in_specs=[
                pl.BlockSpec((T, Bp, Din), lambda d: (0, 0, 0)),      # shared x
                pl.BlockSpec((T, Bp, 1), lambda d: (0, 0, 0)),        # shared mask
                pl.BlockSpec((1, Din, 4 * Hp), lambda d: (d, 0, 0)),  # per-dir W_ih
                pl.BlockSpec((1, Hp, 4 * Hp), lambda d: (d, 0, 0)),   # per-dir W_hh
                pl.BlockSpec((1, 1, 4 * Hp), lambda d: (d, 0, 0)),    # per-dir bias
            ],
            out_specs=(
                # each direction writes its own Hp-wide column half -> no concat
                pl.BlockSpec((T, Bp, Hp), lambda d: (0, 0, d)),
                pl.BlockSpec((1, Bp, Hp), lambda d: (d, 0, 0)),
            ),
            scratch_shapes=[pltpu.VMEM((Bp, Hp), jnp.float32),   # h state
                            pltpu.VMEM((Bp, Hp), jnp.float32)],  # c state
        ),
        compiler_params=pltpu.CompilerParams(
            dimension_semantics=("parallel",)),   # fwd/bwd independent (v7x: 2 TCs)
    )(x_tm, mask_tm, wih_all, whh_all, b_all)


# ----------------------------------------------------------------------------
# Forward pass
# ----------------------------------------------------------------------------
def network_forward(params, text, text_lengths, *, matmul_dtype=jnp.float32):
    """Pallas implementation of Network.forward (inference semantics)."""
    emb = jnp.take(params["embedding"], text, axis=0).astype(jnp.float32)  # (B, T, E)
    B, T, _ = emb.shape
    H = params["hidden_dim"]
    Hp = params["hidden_pad"]
    Bp = _round_up(max(B, 8), 8)

    # time-major; pad batch to the f32 sublane tile (padded rows get length 0)
    x = jnp.transpose(emb, (1, 0, 2))                          # (T, B, E)
    x = jnp.pad(x, ((0, 0), (0, Bp - B), (0, 0)))
    lens = jnp.pad(text_lengths, (0, Bp - B))
    mask = (jnp.arange(T)[:, None] < lens[None, :]).astype(jnp.float32)    # (T, Bp)
    mask = mask[:, :, None]

    hfin = None
    for layer in params["lstm_packed"]:
        x, hfin = bilstm_layer(x, mask, layer["wih"], layer["whh"], layer["b"],
                               hidden_pad=Hp, matmul_dtype=matmul_dtype)

    # torch.cat((hidden[-2], hidden[-1]), dim=1): last layer fwd ++ last layer bwd
    hidden = jnp.concatenate([hfin[0, :B, :H], hfin[1, :B, :H]], axis=1)   # (B, 2H)
    # tiny dense head: left to XLA (a separate pallas_call would be pure launch cost)
    return jax.nn.sigmoid(hidden @ params["fc_w"] + params["fc_b"])


# ----------------------------------------------------------------------------
# Pure-JAX reference (unpadded params) for correctness check
# ----------------------------------------------------------------------------
def _lstm_dir_ref(x_tm, mask_tm, w_ih, w_hh, b):
    T, B, _ = x_tm.shape
    H = w_hh.shape[0]

    def step(carry, inp):
        h, c = carry
        x_t, m_t = inp
        gates = x_t @ w_ih + h @ w_hh + b
        i = jax.nn.sigmoid(gates[:, :H])
        f = jax.nn.sigmoid(gates[:, H:2 * H])
        g = jnp.tanh(gates[:, 2 * H:3 * H])
        o = jax.nn.sigmoid(gates[:, 3 * H:])
        c_new = f * c + i * g
        h_new = o * jnp.tanh(c_new)
        valid = m_t > 0.0
        c2 = jnp.where(valid, c_new, c)
        h2 = jnp.where(valid, h_new, h)
        return (h2, c2), h2 * m_t

    init = (jnp.zeros((B, H), jnp.float32), jnp.zeros((B, H), jnp.float32))
    (h_fin, _), hseq = lax.scan(step, init, (x_tm, mask_tm))
    return hseq, h_fin


def network_forward_ref(params, text, text_lengths):
    emb = jnp.take(params["embedding"], text, axis=0).astype(jnp.float32)
    B, T, _ = emb.shape
    mask = (jnp.arange(T)[None, :] < text_lengths[:, None]).astype(jnp.float32)
    layer_in = jnp.transpose(emb, (1, 0, 2))
    mask_tm = jnp.transpose(mask, (1, 0))[:, :, None]
    hfin_f = hfin_b = None
    for layer in params["lstm"]:
        hseq_f, hfin_f = _lstm_dir_ref(layer_in, mask_tm, *layer["fwd"])
        hseq_b_rev, hfin_b = _lstm_dir_ref(layer_in[::-1], mask_tm[::-1], *layer["bwd"])
        layer_in = jnp.concatenate([hseq_f, hseq_b_rev[::-1]], axis=-1)
    hidden = jnp.concatenate([hfin_f, hfin_b], axis=-1)
    return jax.nn.sigmoid(hidden @ params["fc_w"] + params["fc_b"])


# ----------------------------------------------------------------------------
# Parameter init (PyTorch-layout) + packing into the padded kernel layout
# ----------------------------------------------------------------------------
def pack_lstm_params(lstm_params, embedding_dim, hidden_dim):
    """Pack per-direction weights into (2, ...) stacks with H padded to 128 lanes.

    Gate k of the padded layout occupies columns [k*Hp, k*Hp + H); for layers
    > 0 the input rows are split [0:H) (fwd half) and [Hp:Hp+H) (bwd half) to
    match the padded (T, B, 2*Hp) inter-layer activations. Padding is zero, so
    padded lanes of h/c stay exactly zero through the recurrence.
    """
    H = hidden_dim
    Hp = _round_up(max(H, 128), 128)
    packed = []
    for l, layer in enumerate(lstm_params):
        din_pad = embedding_dim if l == 0 else 2 * Hp
        wih_all = np.zeros((2, din_pad, 4 * Hp), np.float32)
        whh_all = np.zeros((2, Hp, 4 * Hp), np.float32)
        b_all = np.zeros((2, 1, 4 * Hp), np.float32)
        for di, dname in enumerate(("fwd", "bwd")):
            w_ih, w_hh, b = (np.asarray(a) for a in layer[dname])
            for k in range(4):
                src = slice(k * H, (k + 1) * H)
                dst = slice(k * Hp, k * Hp + H)
                if l == 0:
                    wih_all[di, :, dst] = w_ih[:, src]
                else:
                    wih_all[di, 0:H, dst] = w_ih[0:H, src]
                    wih_all[di, Hp:Hp + H, dst] = w_ih[H:2 * H, src]
                whh_all[di, 0:H, dst] = w_hh[:, src]
                b_all[di, 0, dst] = b[0, src]
        packed.append({"wih": jnp.asarray(wih_all),
                       "whh": jnp.asarray(whh_all),
                       "b": jnp.asarray(b_all)})
    return packed, Hp


def init_params(key, vocab_size, embedding_dim, hidden_dim, output_dim, n_layers):
    keys = iter(jax.random.split(key, 8 + 8 * n_layers))
    bound = 1.0 / np.sqrt(hidden_dim)
    params = {"embedding": jax.random.normal(next(keys), (vocab_size, embedding_dim),
                                             jnp.float32)}
    lstm = []
    for l in range(n_layers):
        din = embedding_dim if l == 0 else 2 * hidden_dim
        layer = {}
        for d in ("fwd", "bwd"):
            w_ih = jax.random.uniform(next(keys), (din, 4 * hidden_dim), jnp.float32,
                                      -bound, bound)
            w_hh = jax.random.uniform(next(keys), (hidden_dim, 4 * hidden_dim),
                                      jnp.float32, -bound, bound)
            b_ih = jax.random.uniform(next(keys), (1, 4 * hidden_dim), jnp.float32,
                                      -bound, bound)
            b_hh = jax.random.uniform(next(keys), (1, 4 * hidden_dim), jnp.float32,
                                      -bound, bound)
            layer[d] = (w_ih, w_hh, b_ih + b_hh)   # nn.LSTM: b_ih + b_hh
        lstm.append(layer)
    params["lstm"] = lstm
    fc_bound = 1.0 / np.sqrt(2 * hidden_dim)
    params["fc_w"] = jax.random.uniform(next(keys), (2 * hidden_dim, output_dim),
                                        jnp.float32, -fc_bound, fc_bound)
    params["fc_b"] = jax.random.uniform(next(keys), (1, output_dim), jnp.float32,
                                        -fc_bound, fc_bound)
    params["hidden_dim"] = hidden_dim
    params["lstm_packed"], params["hidden_pad"] = pack_lstm_params(
        lstm, embedding_dim, hidden_dim)
    return params


# ----------------------------------------------------------------------------
if __name__ == "__main__":
    vocab_size, embedding_dim, hidden_dim = 50, 32, 32
    output_dim, n_layers = 1, 2
    B, T = 2, 8

    key = jax.random.PRNGKey(0)
    pkey, tkey = jax.random.split(key)
    params = init_params(pkey, vocab_size, embedding_dim, hidden_dim, output_dim,
                         n_layers)

    text = jax.random.randint(tkey, (B, T), 0, vocab_size, dtype=jnp.int32)
    text_lengths = jnp.array([8, 5], dtype=jnp.int32)   # sorted desc (pack_padded default)

    # NOTE: for v6e/v7x, matmul_dtype=jnp.bfloat16 halves weight VMEM/DMA and runs
    # the MXU at bf16 rate; kept at f32 here to match the f32 reference exactly.
    out = network_forward(params, text, text_lengths, matmul_dtype=jnp.float32)
    out = jax.block_until_ready(out)

    ref = network_forward_ref(params, text, text_lengths)
    np.testing.assert_allclose(np.asarray(out), np.asarray(ref), atol=1e-3, rtol=1e-3)

    assert out.shape == (B, output_dim)
    print("KERNEL_OK")
</pallas_src>

<mosaic_0001>
module attributes {stable_mosaic.version = 11 : i64} {
  func.func @_bilstm_layer_kernel(%arg0: i32, %arg1: memref<8x8x32xf32, #tpu.memory_space<vmem>>, %arg2: memref<8x8x1xf32, #tpu.memory_space<vmem>>, %arg3: memref<1x32x512xf32, #tpu.memory_space<vmem>>, %arg4: memref<1x128x512xf32, #tpu.memory_space<vmem>>, %arg5: memref<1x1x512xf32, #tpu.memory_space<vmem>>, %arg6: memref<8x8x128xf32, #tpu.memory_space<vmem>>, %arg7: memref<1x8x128xf32, #tpu.memory_space<vmem>>, %arg8: memref<8x128xf32, #tpu.memory_space<vmem>>, %arg9: memref<8x128xf32, #tpu.memory_space<vmem>>) attributes {dimension_semantics = [#tpu.dimension_semantics<parallel>], iteration_bounds = array<i64: 2>, scalar_prefetch = 0 : i64, scratch_operands = 2 : i64, tpu.core_type = #tpu.core_type<tc>, window_params = [{pipeline_mode = #tpu.pipeline_mode<synchronous>, transform_indices = @transform_0, window_bounds = array<i64: 8, 8, 32>}, {pipeline_mode = #tpu.pipeline_mode<synchronous>, transform_indices = @transform_1, window_bounds = array<i64: 8, 8, 1>}, {transform_indices = @transform_2, window_bounds = array<i64: 1, 32, 512>}, {transform_indices = @transform_3, window_bounds = array<i64: 1, 128, 512>}, {transform_indices = @transform_4, window_bounds = array<i64: 1, 1, 512>}, {transform_indices = @transform_5, window_bounds = array<i64: 8, 8, 128>}, {transform_indices = @transform_6, window_bounds = array<i64: 1, 8, 128>}]} {
    %c0 = arith.constant 0 : index
    %c0_0 = arith.constant 0 : index
    %c0_1 = arith.constant 0 : index
    %0 = vector.load %arg3[%c0, %c0_0, %c0_1] : memref<1x32x512xf32, #tpu.memory_space<vmem>>, vector<1x32x512xf32>
    %1 = vector.shape_cast %0 : vector<1x32x512xf32> to vector<32x512xf32>
    %c0_2 = arith.constant 0 : index
    %c0_3 = arith.constant 0 : index
    %c0_4 = arith.constant 0 : index
    %2 = vector.load %arg4[%c0_2, %c0_3, %c0_4] : memref<1x128x512xf32, #tpu.memory_space<vmem>>, vector<1x128x512xf32>
    %3 = vector.shape_cast %2 : vector<1x128x512xf32> to vector<128x512xf32>
    %c0_5 = arith.constant 0 : index
    %c0_6 = arith.constant 0 : index
    %c0_7 = arith.constant 0 : index
    %4 = vector.load %arg5[%c0_5, %c0_6, %c0_7] : memref<1x1x512xf32, #tpu.memory_space<vmem>>, vector<1x1x512xf32>
    %5 = vector.shape_cast %4 : vector<1x1x512xf32> to vector<1x512xf32>
    %cst = arith.constant 0.000000e+00 : f32
    %6 = vector.broadcast %cst : f32 to vector<8x128xf32>
    %c0_8 = arith.constant 0 : index
    %c0_9 = arith.constant 0 : index
    %7 = vector.load %arg8[%c0_8, %c0_9] : memref<8x128xf32, #tpu.memory_space<vmem>>, vector<8x128xf32>
    tpu.vector_store %arg8[%c0_8, %c0_9], %6 {strides = array<i32>} : memref<8x128xf32, #tpu.memory_space<vmem>>, vector<8x128xf32>,
    %cst_10 = arith.constant 0.000000e+00 : f32
    %8 = vector.broadcast %cst_10 : f32 to vector<8x128xf32>
    %c0_11 = arith.constant 0 : index
    %c0_12 = arith.constant 0 : index
    %9 = vector.load %arg9[%c0_11, %c0_12] : memref<8x128xf32, #tpu.memory_space<vmem>>, vector<8x128xf32>
    tpu.vector_store %arg9[%c0_11, %c0_12], %8 {strides = array<i32>} : memref<8x128xf32, #tpu.memory_space<vmem>>, vector<8x128xf32>,
    %c0_i32 = arith.constant 0 : i32
    %c0_i32_13 = arith.constant 0 : i32
    %10 = arith.cmpi eq, %arg0, %c0_i32_13 : i32
    %c7_i32 = arith.constant 7 : i32
    %11 = arith.subi %c7_i32, %c0_i32 : i32
    %12 = arith.select %10, %c0_i32, %11 : i32
    %13 = arith.index_cast %12 : i32 to index
    %c0_14 = arith.constant 0 : index
    %c0_15 = arith.constant 0 : index
    %14 = vector.load %arg1[%13, %c0_14, %c0_15] : memref<8x8x32xf32, #tpu.memory_space<vmem>>, vector<1x8x32xf32>
    %15 = vector.shape_cast %14 : vector<1x8x32xf32> to vector<8x32xf32>
    %16 = arith.index_cast %12 : i32 to index
    %c0_16 = arith.constant 0 : index
    %c0_17 = arith.constant 0 : index
    %17 = vector.load %arg2[%16, %c0_16, %c0_17] : memref<8x8x1xf32, #tpu.memory_space<vmem>>, vector<1x8x1xf32>
    %18 = vector.shape_cast %17 : vector<1x8x1xf32> to vector<8x1xf32>
    %c0_18 = arith.constant 0 : index
    %c0_19 = arith.constant 0 : index
    %19 = vector.load %arg8[%c0_18, %c0_19] : memref<8x128xf32, #tpu.memory_space<vmem>>, vector<8x128xf32>
    %c0_20 = arith.constant 0 : index
    %c0_21 = arith.constant 0 : index
    %20 = vector.load %arg9[%c0_20, %c0_21] : memref<8x128xf32, #tpu.memory_space<vmem>>, vector<8x128xf32>
    %cst_22 = arith.constant dense<0.000000e+00> : vector<8x512xf32>
    %21 = tpu.matmul %15, %1, %cst_22 {dimension_numbers = #tpu.dot_dimension_numbers<[1], [0], [0], [1], [0, 0, 1, 1], [], []>} : vector<8x32xf32>, vector<32x512xf32>, vector<8x512xf32> -> vector<8x512xf32>
    %cst_23 = arith.constant dense<0.000000e+00> : vector<8x512xf32>
    %22 = tpu.matmul %19, %3, %cst_23 {dimension_numbers = #tpu.dot_dimension_numbers<[1], [0], [0], [1], [0, 0, 1, 1], [], []>} : vector<8x128xf32>, vector<128x512xf32>, vector<8x512xf32> -> vector<8x512xf32>
    %23 = arith.addf %21, %22 : vector<8x512xf32>
    %24 = vector.broadcast %5 : vector<1x512xf32> to vector<8x512xf32>
    %25 = arith.addf %23, %24 : vector<8x512xf32>
    %26 = vector.extract_strided_slice %25 {offsets = [0, 0], sizes = [8, 128], strides = [1, 1]} : vector<8x512xf32> to vector<8x128xf32>
    %27 = arith.negf %26 : vector<8x128xf32>
    %28 = math.exp %27 : vector<8x128xf32>
    %cst_24 = arith.constant 1.000000e+00 : f32
    %29 = vector.broadcast %cst_24 : f32 to vector<8x128xf32>
    %30 = arith.addf %29, %28 : vector<8x128xf32>
    %31 = arith.divf %29, %30 : vector<8x128xf32>
    %32 = vector.extract_strided_slice %25 {offsets = [0, 128], sizes = [8, 128], strides = [1, 1]} : vector<8x512xf32> to vector<8x128xf32>
    %33 = arith.negf %32 : vector<8x128xf32>
    %34 = math.exp %33 : vector<8x128xf32>
    %cst_25 = arith.constant 1.000000e+00 : f32
    %35 = vector.broadcast %cst_25 : f32 to vector<8x128xf32>
    %36 = arith.addf %35, %34 : vector<8x128xf32>
    %37 = arith.divf %35, %36 : vector<8x128xf32>
    %38 = vector.extract_strided_slice %25 {offsets = [0, 256], sizes = [8, 128], strides = [1, 1]} : vector<8x512xf32> to vector<8x128xf32>
    %39 = math.tanh %38 : vector<8x128xf32>
    %40 = vector.extract_strided_slice %25 {offsets = [0, 384], sizes = [8, 128], strides = [1, 1]} : vector<8x512xf32> to vector<8x128xf32>
    %41 = arith.negf %40 : vector<8x128xf32>
    %42 = math.exp %41 : vector<8x128xf32>
    %cst_26 = arith.constant 1.000000e+00 : f32
    %43 = vector.broadcast %cst_26 : f32 to vector<8x128xf32>
    %44 = arith.addf %43, %42 : vector<8x128xf32>
    %45 = arith.divf %43, %44 : vector<8x128xf32>
    %46 = arith.mulf %37, %20 : vector<8x128xf32>
    %47 = arith.mulf %31, %39 : vector<8x128xf32>
    %48 = arith.addf %46, %47 : vector<8x128xf32>
    %49 = math.tanh %48 : vector<8x128xf32>
    %50 = arith.mulf %45, %49 : vector<8x128xf32>
    %cst_27 = arith.constant 0.000000e+00 : f32
    %51 = vector.broadcast %cst_27 : f32 to vector<8x1xf32>
    %52 = arith.cmpf ogt, %18, %51 : vector<8x1xf32>
    %53 = vector.shape_cast %52 : vector<8x1xi1> to vector<8x1xi1>
    %54 = vector.broadcast %53 : vector<8x1xi1> to vector<8x128xi1>
    %55 = arith.select %54, %48, %20 : vector<8x128xi1>, vector<8x128xf32>
    %56 = vector.shape_cast %52 : vector<8x1xi1> to vector<8x1xi1>
    %57 = vector.broadcast %56 : vector<8x1xi1> to vector<8x128xi1>
    %58 = arith.select %57, %50, %19 : vector<8x128xi1>, vector<8x128xf32>
    %c0_28 = arith.constant 0 : index
    %c0_29 = arith.constant 0 : index
    %59 = vector.load %arg9[%c0_28, %c0_29] : memref<8x128xf32, #tpu.memory_space<vmem>>, vector<8x128xf32>
    tpu.vector_store %arg9[%c0_28, %c0_29], %55 {strides = array<i32>} : memref<8x128xf32, #tpu.memory_space<vmem>>, vector<8x128xf32>,
    %c0_30 = arith.constant 0 : index
    %c0_31 = arith.constant 0 : index
    %60 = vector.load %arg8[%c0_30, %c0_31] : memref<8x128xf32, #tpu.memory_space<vmem>>, vector<8x128xf32>
    tpu.vector_store %arg8[%c0_30, %c0_31], %58 {strides = array<i32>} : memref<8x128xf32, #tpu.memory_space<vmem>>, vector<8x128xf32>,
    %61 = vector.broadcast %18 : vector<8x1xf32> to vector<8x128xf32>
    %62 = arith.mulf %58, %61 : vector<8x128xf32>
    %63 = arith.index_cast %12 : i32 to index
    %c0_32 = arith.constant 0 : index
    %c0_33 = arith.constant 0 : index
    %64 = vector.load %arg6[%63, %c0_32, %c0_33] : memref<8x8x128xf32, #tpu.memory_space<vmem>>, vector<1x8x128xf32>
    %65 = vector.shape_cast %64 : vector<1x8x128xf32> to vector<8x128xf32>
    %66 = vector.shape_cast %62 : vector<8x128xf32> to vector<1x8x128xf32>
    tpu.vector_store %arg6[%63, %c0_32, %c0_33], %66 {strides = array<i32>} : memref<8x8x128xf32, #tpu.memory_space<vmem>>, vector<1x8x128xf32>,
    %c1_i32 = arith.constant 1 : i32
    %c0_i32_34 = arith.constant 0 : i32
    %67 = arith.cmpi eq, %arg0, %c0_i32_34 : i32
    %c7_i32_35 = arith.constant 7 : i32
    %68 = arith.subi %c7_i32_35, %c1_i32 : i32
    %69 = arith.select %67, %c1_i32, %68 : i32
    %70 = arith.index_cast %69 : i32 to index
    %c0_36 = arith.constant 0 : index
    %c0_37 = arith.constant 0 : index
    %71 = vector.load %arg1[%70, %c0_36, %c0_37] : memref<8x8x32xf32, #tpu.memory_space<vmem>>, vector<1x8x32xf32>
    %72 = vector.shape_cast %71 : vector<1x8x32xf32> to vector<8x32xf32>
    %73 = arith.index_cast %69 : i32 to index
    %c0_38 = arith.constant 0 : index
    %c0_39 = arith.constant 0 : index
    %74 = vector.load %arg2[%73, %c0_38, %c0_39] : memref<8x8x1xf32, #tpu.memory_space<vmem>>, vector<1x8x1xf32>
    %75 = vector.shape_cast %74 : vector<1x8x1xf32> to vector<8x1xf32>
    %c0_40 = arith.constant 0 : index
    %c0_41 = arith.constant 0 : index
    %76 = vector.load %arg8[%c0_40, %c0_41] : memref<8x128xf32, #tpu.memory_space<vmem>>, vector<8x128xf32>
    %c0_42 = arith.constant 0 : index
    %c0_43 = arith.constant 0 : index
    %77 = vector.load %arg9[%c0_42, %c0_43] : memref<8x128xf32, #tpu.memory_space<vmem>>, vector<8x128xf32>
    %cst_44 = arith.constant dense<0.000000e+00> : vector<8x512xf32>
    %78 = tpu.matmul %72, %1, %cst_44 {dimension_numbers = #tpu.dot_dimension_numbers<[1], [0], [0], [1], [0, 0, 1, 1], [], []>} : vector<8x32xf32>, vector<32x512xf32>, vector<8x512xf32> -> vector<8x512xf32>
    %cst_45 = arith.constant dense<0.000000e+00> : vector<8x512xf32>
    %79 = tpu.matmul %76, %3, %cst_45 {dimension_numbers = #tpu.dot_dimension_numbers<[1], [0], [0], [1], [0, 0, 1, 1], [], []>} : vector<8x128xf32>, vector<128x512xf32>, vector<8x512xf32> -> vector<8x512xf32>
    %80 = arith.addf %78, %79 : vector<8x512xf32>
    %81 = vector.broadcast %5 : vector<1x512xf32> to vector<8x512xf32>
    %82 = arith.addf %80, %81 : vector<8x512xf32>
    %83 = vector.extract_strided_slice %82 {offsets = [0, 0], sizes = [8, 128], strides = [1, 1]} : vector<8x512xf32> to vector<8x128xf32>
    %84 = arith.negf %83 : vector<8x128xf32>
    %85 = math.exp %84 : vector<8x128xf32>
    %cst_46 = arith.constant 1.000000e+00 : f32
    %86 = vector.broadcast %cst_46 : f32 to vector<8x128xf32>
    %87 = arith.addf %86, %85 : vector<8x128xf32>
    %88 = arith.divf %86, %87 : vector<8x128xf32>
    %89 = vector.extract_strided_slice %82 {offsets = [0, 128], sizes = [8, 128], strides = [1, 1]} : vector<8x512xf32> to vector<8x128xf32>
    %90 = arith.negf %89 : vector<8x128xf32>
    %91 = math.exp %90 : vector<8x128xf32>
    %cst_47 = arith.constant 1.000000e+00 : f32
    %92 = vector.broadcast %cst_47 : f32 to vector<8x128xf32>
    %93 = arith.addf %92, %91 : vector<8x128xf32>
    %94 = arith.divf %92, %93 : vector<8x128xf32>
    %95 = vector.extract_strided_slice %82 {offsets = [0, 256], sizes = [8, 128], strides = [1, 1]} : vector<8x512xf32> to vector<8x128xf32>
    %96 = math.tanh %95 : vector<8x128xf32>
    %97 = vector.extract_strided_slice %82 {offsets = [0, 384], sizes = [8, 128], strides = [1, 1]} : vector<8x512xf32> to vector<8x128xf32>
    %98 = arith.negf %97 : vector<8x128xf32>
    %99 = math.exp %98 : vector<8x128xf32>
    %cst_48 = arith.constant 1.000000e+00 : f32
    %100 = vector.broadcast %cst_48 : f32 to vector<8x128xf32>
    %101 = arith.addf %100, %99 : vector<8x128xf32>
    %102 = arith.divf %100, %101 : vector<8x128xf32>
    %103 = arith.mulf %94, %77 : vector<8x128xf32>
    %104 = arith.mulf %88, %96 : vector<8x128xf32>
    %105 = arith.addf %103, %104 : vector<8x128xf32>
    %106 = math.tanh %105 : vector<8x128xf32>
    %107 = arith.mulf %102, %106 : vector<8x128xf32>
    %cst_49 = arith.constant 0.000000e+00 : f32
    %108 = vector.broadcast %cst_49 : f32 to vector<8x1xf32>
    %109 = arith.cmpf ogt, %75, %108 : vector<8x1xf32>
    %110 = vector.shape_cast %109 : vector<8x1xi1> to vector<8x1xi1>
    %111 = vector.broadcast %110 : vector<8x1xi1> to vector<8x128xi1>
    %112 = arith.select %111, %105, %77 : vector<8x128xi1>, vector<8x128xf32>
    %113 = vector.shape_cast %109 : vector<8x1xi1> to vector<8x1xi1>
    %114 = vector.broadcast %113 : vector<8x1xi1> to vector<8x128xi1>
    %115 = arith.select %114, %107, %76 : vector<8x128xi1>, vector<8x128xf32>
    %c0_50 = arith.constant 0 : index
    %c0_51 = arith.constant 0 : index
    %116 = vector.load %arg9[%c0_50, %c0_51] : memref<8x128xf32, #tpu.memory_space<vmem>>, vector<8x128xf32>
    tpu.vector_store %arg9[%c0_50, %c0_51], %112 {strides = array<i32>} : memref<8x128xf32, #tpu.memory_space<vmem>>, vector<8x128xf32>,
    %c0_52 = arith.constant 0 : index
    %c0_53 = arith.constant 0 : index
    %117 = vector.load %arg8[%c0_52, %c0_53] : memref<8x128xf32, #tpu.memory_space<vmem>>, vector<8x128xf32>
    tpu.vector_store %arg8[%c0_52, %c0_53], %115 {strides = array<i32>} : memref<8x128xf32, #tpu.memory_space<vmem>>, vector<8x128xf32>,
    %118 = vector.broadcast %75 : vector<8x1xf32> to vector<8x128xf32>
    %119 = arith.mulf %115, %118 : vector<8x128xf32>
    %120 = arith.index_cast %69 : i32 to index
    %c0_54 = arith.constant 0 : index
    %c0_55 = arith.constant 0 : index
    %121 = vector.load %arg6[%120, %c0_54, %c0_55] : memref<8x8x128xf32, #tpu.memory_space<vmem>>, vector<1x8x128xf32>
    %122 = vector.shape_cast %121 : vector<1x8x128xf32> to vector<8x128xf32>
    %123 = vector.shape_cast %119 : vector<8x128xf32> to vector<1x8x128xf32>
    tpu.vector_store %arg6[%120, %c0_54, %c0_55], %123 {strides = array<i32>} : memref<8x8x128xf32, #tpu.memory_space<vmem>>, vector<1x8x128xf32>,
    %c2_i32 = arith.constant 2 : i32
    %c0_i32_56 = arith.constant 0 : i32
    %124 = arith.cmpi eq, %arg0, %c0_i32_56 : i32
    %c7_i32_57 = arith.constant 7 : i32
    %125 = arith.subi %c7_i32_57, %c2_i32 : i32
    %126 = arith.select %124, %c2_i32, %125 : i32
    %127 = arith.index_cast %126 : i32 to index
    %c0_58 = arith.constant 0 : index
    %c0_59 = arith.constant 0 : index
    %128 = vector.load %arg1[%127, %c0_58, %c0_59] : memref<8x8x32xf32, #tpu.memory_space<vmem>>, vector<1x8x32xf32>
    %129 = vector.shape_cast %128 : vector<1x8x32xf32> to vector<8x32xf32>
    %130 = arith.index_cast %126 : i32 to index
    %c0_60 = arith.constant 0 : index
    %c0_61 = arith.constant 0 : index
    %131 = vector.load %arg2[%130, %c0_60, %c0_61] : memref<8x8x1xf32, #tpu.memory_space<vmem>>, vector<1x8x1xf32>
    %132 = vector.shape_cast %131 : vector<1x8x1xf32> to vector<8x1xf32>
    %c0_62 = arith.constant 0 : index
    %c0_63 = arith.constant 0 : index
    %133 = vector.load %arg8[%c0_62, %c0_63] : memref<8x128xf32, #tpu.memory_space<vmem>>, vector<8x128xf32>
    %c0_64 = arith.constant 0 : index
    %c0_65 = arith.constant 0 : index
    %134 = vector.load %arg9[%c0_64, %c0_65] : memref<8x128xf32, #tpu.memory_space<vmem>>, vector<8x128xf32>
    %cst_66 = arith.constant dense<0.000000e+00> : vector<8x512xf32>
    %135 = tpu.matmul %129, %1, %cst_66 {dimension_numbers = #tpu.dot_dimension_numbers<[1], [0], [0], [1], [0, 0, 1, 1], [], []>} : vector<8x32xf32>, vector<32x512xf32>, vector<8x512xf32> -> vector<8x512xf32>
    %cst_67 = arith.constant dense<0.000000e+00> : vector<8x512xf32>
    %136 = tpu.matmul %133, %3, %cst_67 {dimension_numbers = #tpu.dot_dimension_numbers<[1], [0], [0], [1], [0, 0, 1, 1], [], []>} : vector<8x128xf32>, vector<128x512xf32>, vector<8x512xf32> -> vector<8x512xf32>
    %137 = arith.addf %135, %136 : vector<8x512xf32>
    %138 = vector.broadcast %5 : vector<1x512xf32> to vector<8x512xf32>
    %139 = arith.addf %137, %138 : vector<8x512xf32>
    %140 = vector.extract_strided_slice %139 {offsets = [0, 0], sizes = [8, 128], strides = [1, 1]} : vector<8x512xf32> to vector<8x128xf32>
    %141 = arith.negf %140 : vector<8x128xf32>
    %142 = math.exp %141 : vector<8x128xf32>
    %cst_68 = arith.constant 1.000000e+00 : f32
    %143 = vector.broadcast %cst_68 : f32 to vector<8x128xf32>
    %144 = arith.addf %143, %142 : vector<8x128xf32>
    %145 = arith.divf %143, %144 : vector<8x128xf32>
    %146 = vector.extract_strided_slice %139 {offsets = [0, 128], sizes = [8, 128], strides = [1, 1]} : vector<8x512xf32> to vector<8x128xf32>
    %147 = arith.negf %146 : vector<8x128xf32>
    %148 = math.exp %147 : vector<8x128xf32>
    %cst_69 = arith.constant 1.000000e+00 : f32
    %149 = vector.broadcast %cst_69 : f32 to vector<8x128xf32>
    %150 = arith.addf %149, %148 : vector<8x128xf32>
    %151 = arith.divf %149, %150 : vector<8x128xf32>
    %152 = vector.extract_strided_slice %139 {offsets = [0, 256], sizes = [8, 128], strides = [1, 1]} : vector<8x512xf32> to vector<8x128xf32>
    %153 = math.tanh %152 : vector<8x128xf32>
    %154 = vector.extract_strided_slice %139 {offsets = [0, 384], sizes = [8, 128], strides = [1, 1]} : vector<8x512xf32> to vector<8x128xf32>
    %155 = arith.negf %154 : vector<8x128xf32>
    %156 = math.exp %155 : vector<8x128xf32>
    %cst_70 = arith.constant 1.000000e+00 : f32
    %157 = vector.broadcast %cst_70 : f32 to vector<8x128xf32>
    %158 = arith.addf %157, %156 : vector<8x128xf32>
    %159 = arith.divf %157, %158 : vector<8x128xf32>
    %160 = arith.mulf %151, %134 : vector<8x128xf32>
    %161 = arith.mulf %145, %153 : vector<8x128xf32>
    %162 = arith.addf %160, %161 : vector<8x128xf32>
    %163 = math.tanh %162 : vector<8x128xf32>
    %164 = arith.mulf %159, %163 : vector<8x128xf32>
    %cst_71 = arith.constant 0.000000e+00 : f32
    %165 = vector.broadcast %cst_71 : f32 to vector<8x1xf32>
    %166 = arith.cmpf ogt, %132, %165 : vector<8x1xf32>
    %167 = vector.shape_cast %166 : vector<8x1xi1> to vector<8x1xi1>
    %168 = vector.broadcast %167 : vector<8x1xi1> to vector<8x128xi1>
    %169 = arith.select %168, %162, %134 : vector<8x128xi1>, vector<8x128xf32>
    %170 = vector.shape_cast %166 : vector<8x1xi1> to vector<8x1xi1>
    %171 = vector.broadcast %170 : vector<8x1xi1> to vector<8x128xi1>
    %172 = arith.select %171, %164, %133 : vector<8x128xi1>, vector<8x128xf32>
    %c0_72 = arith.constant 0 : index
    %c0_73 = arith.constant 0 : index
    %173 = vector.load %arg9[%c0_72, %c0_73] : memref<8x128xf32, #tpu.memory_space<vmem>>, vector<8x128xf32>
    tpu.vector_store %arg9[%c0_72, %c0_73], %169 {strides = array<i32>} : memref<8x128xf32, #tpu.memory_space<vmem>>, vector<8x128xf32>,
    %c0_74 = arith.constant 0 : index
    %c0_75 = arith.constant 0 : index
    %174 = vector.load %arg8[%c0_74, %c0_75] : memref<8x128xf32, #tpu.memory_space<vmem>>, vector<8x128xf32>
    tpu.vector_store %arg8[%c0_74, %c0_75], %172 {strides = array<i32>} : memref<8x128xf32, #tpu.memory_space<vmem>>, vector<8x128xf32>,
    %175 = vector.broadcast %132 : vector<8x1xf32> to vector<8x128xf32>
    %176 = arith.mulf %172, %175 : vector<8x128xf32>
    %177 = arith.index_cast %126 : i32 to index
    %c0_76 = arith.constant 0 : index
    %c0_77 = arith.constant 0 : index
    %178 = vector.load %arg6[%177, %c0_76, %c0_77] : memref<8x8x128xf32, #tpu.memory_space<vmem>>, vector<1x8x128xf32>
    %179 = vector.shape_cast %178 : vector<1x8x128xf32> to vector<8x128xf32>
    %180 = vector.shape_cast %176 : vector<8x128xf32> to vector<1x8x128xf32>
    tpu.vector_store %arg6[%177, %c0_76, %c0_77], %180 {strides = array<i32>} : memref<8x8x128xf32, #tpu.memory_space<vmem>>, vector<1x8x128xf32>,
    %c3_i32 = arith.constant 3 : i32
    %c0_i32_78 = arith.constant 0 : i32
    %181 = arith.cmpi eq, %arg0, %c0_i32_78 : i32
    %c7_i32_79 = arith.constant 7 : i32
    %182 = arith.subi %c7_i32_79, %c3_i32 : i32
    %183 = arith.select %181, %c3_i32, %182 : i32
    %184 = arith.index_cast %183 : i32 to index
    %c0_80 = arith.constant 0 : index
    %c0_81 = arith.constant 0 : index
    %185 = vector.load %arg1[%184, %c0_80, %c0_81] : memref<8x8x32xf32, #tpu.memory_space<vmem>>, vector<1x8x32xf32>
    %186 = vector.shape_cast %185 : vector<1x8x32xf32> to vector<8x32xf32>
    %187 = arith.index_cast %183 : i32 to index
    %c0_82 = arith.constant 0 : index
    %c0_83 = arith.constant 0 : index
    %188 = vector.load %arg2[%187, %c0_82, %c0_83] : memref<8x8x1xf32, #tpu.memory_space<vmem>>, vector<1x8x1xf32>
    %189 = vector.shape_cast %188 : vector<1x8x1xf32> to vector<8x1xf32>
    %c0_84 = arith.constant 0 : index
    %c0_85 = arith.constant 0 : index
    %190 = vector.load %arg8[%c0_84, %c0_85] : memref<8x128xf32, #tpu.memory_space<vmem>>, vector<8x128xf32>
    %c0_86 = arith.constant 0 : index
    %c0_87 = arith.constant 0 : index
    %191 = vector.load %arg9[%c0_86, %c0_87] : memref<8x128xf32, #tpu.memory_space<vmem>>, vector<8x128xf32>
    %cst_88 = arith.constant dense<0.000000e+00> : vector<8x512xf32>
    %192 = tpu.matmul %186, %1, %cst_88 {dimension_numbers = #tpu.dot_dimension_numbers<[1], [0], [0], [1], [0, 0, 1, 1], [], []>} : vector<8x32xf32>, vector<32x512xf32>, vector<8x512xf32> -> vector<8x512xf32>
    %cst_89 = arith.constant dense<0.000000e+00> : vector<8x512xf32>
    %193 = tpu.matmul %190, %3, %cst_89 {dimension_numbers = #tpu.dot_dimension_numbers<[1], [0], [0], [1], [0, 0, 1, 1], [], []>} : vector<8x128xf32>, vector<128x512xf32>, vector<8x512xf32> -> vector<8x512xf32>
    %194 = arith.addf %192, %193 : vector<8x512xf32>
    %195 = vector.broadcast %5 : vector<1x512xf32> to vector<8x512xf32>
    %196 = arith.addf %194, %195 : vector<8x512xf32>
    %197 = vector.extract_strided_slice %196 {offsets = [0, 0], sizes = [8, 128], strides = [1, 1]} : vector<8x512xf32> to vector<8x128xf32>
    %198 = arith.negf %197 : vector<8x128xf32>
    %199 = math.exp %198 : vector<8x128xf32>
    %cst_90 = arith.constant 1.000000e+00 : f32
    %200 = vector.broadcast %cst_90 : f32 to vector<8x128xf32>
    %201 = arith.addf %200, %199 : vector<8x128xf32>
    %202 = arith.divf %200, %201 : vector<8x128xf32>
    %203 = vector.extract_strided_slice %196 {offsets = [0, 128], sizes = [8, 128], strides = [1, 1]} : vector<8x512xf32> to vector<8x128xf32>
    %204 = arith.negf %203 : vector<8x128xf32>
    %205 = math.exp %204 : vector<8x128xf32>
    %cst_91 = arith.constant 1.000000e+00 : f32
    %206 = vector.broadcast %cst_91 : f32 to vector<8x128xf32>
    %207 = arith.addf %206, %205 : vector<8x128xf32>
    %208 = arith.divf %206, %207 : vector<8x128xf32>
    %209 = vector.extract_strided_slice %196 {offsets = [0, 256], sizes = [8, 128], strides = [1, 1]} : vector<8x512xf32> to vector<8x128xf32>
    %210 = math.tanh %209 : vector<8x128xf32>
    %211 = vector.extract_strided_slice %196 {offsets = [0, 384], sizes = [8, 128], strides = [1, 1]} : vector<8x512xf32> to vector<8x128xf32>
    %212 = arith.negf %211 : vector<8x128xf32>
    %213 = math.exp %212 : vector<8x128xf32>
    %cst_92 = arith.constant 1.000000e+00 : f32
    %214 = vector.broadcast %cst_92 : f32 to vector<8x128xf32>
    %215 = arith.addf %214, %213 : vector<8x128xf32>
    %216 = arith.divf %214, %215 : vector<8x128xf32>
    %217 = arith.mulf %208, %191 : vector<8x128xf32>
    %218 = arith.mulf %202, %210 : vector<8x128xf32>
    %219 = arith.addf %217, %218 : vector<8x128xf32>
    %220 = math.tanh %219 : vector<8x128xf32>
    %221 = arith.mulf %216, %220 : vector<8x128xf32>
    %cst_93 = arith.constant 0.000000e+00 : f32
    %222 = vector.broadcast %cst_93 : f32 to vector<8x1xf32>
    %223 = arith.cmpf ogt, %189, %222 : vector<8x1xf32>
    %224 = vector.shape_cast %223 : vector<8x1xi1> to vector<8x1xi1>
    %225 = vector.broadcast %224 : vector<8x1xi1> to vector<8x128xi1>
    %226 = arith.select %225, %219, %191 : vector<8x128xi1>, vector<8x128xf32>
    %227 = vector.shape_cast %223 : vector<8x1xi1> to vector<8x1xi1>
    %228 = vector.broadcast %227 : vector<8x1xi1> to vector<8x128xi1>
    %229 = arith.select %228, %221, %190 : vector<8x128xi1>, vector<8x128xf32>
    %c0_94 = arith.constant 0 : index
    %c0_95 = arith.constant 0 : index
    %230 = vector.load %arg9[%c0_94, %c0_95] : memref<8x128xf32, #tpu.memory_space<vmem>>, vector<8x128xf32>
    tpu.vector_store %arg9[%c0_94, %c0_95], %226 {strides = array<i32>} : memref<8x128xf32, #tpu.memory_space<vmem>>, vector<8x128xf32>,
    %c0_96 = arith.constant 0 : index
    %c0_97 = arith.constant 0 : index
    %231 = vector.load %arg8[%c0_96, %c0_97] : memref<8x128xf32, #tpu.memory_space<vmem>>, vector<8x128xf32>
    tpu.vector_store %arg8[%c0_96, %c0_97], %229 {strides = array<i32>} : memref<8x128xf32, #tpu.memory_space<vmem>>, vector<8x128xf32>,
    %232 = vector.broadcast %189 : vector<8x1xf32> to vector<8x128xf32>
    %233 = arith.mulf %229, %232 : vector<8x128xf32>
    %234 = arith.index_cast %183 : i32 to index
    %c0_98 = arith.constant 0 : index
    %c0_99 = arith.constant 0 : index
    %235 = vector.load %arg6[%234, %c0_98, %c0_99] : memref<8x8x128xf32, #tpu.memory_space<vmem>>, vector<1x8x128xf32>
    %236 = vector.shape_cast %235 : vector<1x8x128xf32> to vector<8x128xf32>
    %237 = vector.shape_cast %233 : vector<8x128xf32> to vector<1x8x128xf32>
    tpu.vector_store %arg6[%234, %c0_98, %c0_99], %237 {strides = array<i32>} : memref<8x8x128xf32, #tpu.memory_space<vmem>>, vector<1x8x128xf32>,
    %c4_i32 = arith.constant 4 : i32
    %c0_i32_100 = arith.constant 0 : i32
    %238 = arith.cmpi eq, %arg0, %c0_i32_100 : i32
    %c7_i32_101 = arith.constant 7 : i32
    %239 = arith.subi %c7_i32_101, %c4_i32 : i32
    %240 = arith.select %238, %c4_i32, %239 : i32
    %241 = arith.index_cast %240 : i32 to index
    %c0_102 = arith.constant 0 : index
    %c0_103 = arith.constant 0 : index
    %242 = vector.load %arg1[%241, %c0_102, %c0_103] : memref<8x8x32xf32, #tpu.memory_space<vmem>>, vector<1x8x32xf32>
    %243 = vector.shape_cast %242 : vector<1x8x32xf32> to vector<8x32xf32>
    %244 = arith.index_cast %240 : i32 to index
    %c0_104 = arith.constant 0 : index
    %c0_105 = arith.constant 0 : index
    %245 = vector.load %arg2[%244, %c0_104, %c0_105] : memref<8x8x1xf32, #tpu.memory_space<vmem>>, vector<1x8x1xf32>
    %246 = vector.shape_cast %245 : vector<1x8x1xf32> to vector<8x1xf32>
    %c0_106 = arith.constant 0 : index
    %c0_107 = arith.constant 0 : index
    %247 = vector.load %arg8[%c0_106, %c0_107] : memref<8x128xf32, #tpu.memory_space<vmem>>, vector<8x128xf32>
    %c0_108 = arith.constant 0 : index
    %c0_109 = arith.constant 0 : index
    %248 = vector.load %arg9[%c0_108, %c0_109] : memref<8x128xf32, #tpu.memory_space<vmem>>, vector<8x128xf32>
    %cst_110 = arith.constant dense<0.000000e+00> : vector<8x512xf32>
    %249 = tpu.matmul %243, %1, %cst_110 {dimension_numbers = #tpu.dot_dimension_numbers<[1], [0], [0], [1], [0, 0, 1, 1], [], []>} : vector<8x32xf32>, vector<32x512xf32>, vector<8x512xf32> -> vector<8x512xf32>
    %cst_111 = arith.constant dense<0.000000e+00> : vector<8x512xf32>
    %250 = tpu.matmul %247, %3, %cst_111 {dimension_numbers = #tpu.dot_dimension_numbers<[1], [0], [0], [1], [0, 0, 1, 1], [], []>} : vector<8x128xf32>, vector<128x512xf32>, vector<8x512xf32> -> vector<8x512xf32>
    %251 = arith.addf %249, %250 : vector<8x512xf32>
    %252 = vector.broadcast %5 : vector<1x512xf32> to vector<8x512xf32>
    %253 = arith.addf %251, %252 : vector<8x512xf32>
    %254 = vector.extract_strided_slice %253 {offsets = [0, 0], sizes = [8, 128], strides = [1, 1]} : vector<8x512xf32> to vector<8x128xf32>
    %255 = arith.negf %254 : vector<8x128xf32>
    %256 = math.exp %255 : vector<8x128xf32>
    %cst_112 = arith.constant 1.000000e+00 : f32
    %257 = vector.broadcast %cst_112 : f32 to vector<8x128xf32>
    %258 = arith.addf %257, %256 : vector<8x128xf32>
    %259 = arith.divf %257, %258 : vector<8x128xf32>
    %260 = vector.extract_strided_slice %253 {offsets = [0, 128], sizes = [8, 128], strides = [1, 1]} : vector<8x512xf32> to vector<8x128xf32>
    %261 = arith.negf %260 : vector<8x128xf32>
    %262 = math.exp %261 : vector<8x128xf32>
    %cst_113 = arith.constant 1.000000e+00 : f32
    %263 = vector.broadcast %cst_113 : f32 to vector<8x128xf32>
    %264 = arith.addf %263, %262 : vector<8x128xf32>
    %265 = arith.divf %263, %264 : vector<8x128xf32>
    %266 = vector.extract_strided_slice %253 {offsets = [0, 256], sizes = [8, 128], strides = [1, 1]} : vector<8x512xf32> to vector<8x128xf32>
    %267 = math.tanh %266 : vector<8x128xf32>
    %268 = vector.extract_strided_slice %253 {offsets = [0, 384], sizes = [8, 128], strides = [1, 1]} : vector<8x512xf32> to vector<8x128xf32>
    %269 = arith.negf %268 : vector<8x128xf32>
    %270 = math.exp %269 : vector<8x128xf32>
    %cst_114 = arith.constant 1.000000e+00 : f32
    %271 = vector.broadcast %cst_114 : f32 to vector<8x128xf32>
    %272 = arith.addf %271, %270 : vector<8x128xf32>
    %273 = arith.divf %271, %272 : vector<8x128xf32>
    %274 = arith.mulf %265, %248 : vector<8x128xf32>
    %275 = arith.mulf %259, %267 : vector<8x128xf32>
    %276 = arith.addf %274, %275 : vector<8x128xf32>
    %277 = math.tanh %276 : vector<8x128xf32>
    %278 = arith.mulf %273, %277 : vector<8x128xf32>
    %cst_115 = arith.constant 0.000000e+00 : f32
    %279 = vector.broadcast %cst_115 : f32 to vector<8x1xf32>
    %280 = arith.cmpf ogt, %246, %279 : vector<8x1xf32>
    %281 = vector.shape_cast %280 : vector<8x1xi1> to vector<8x1xi1>
    %282 = vector.broadcast %281 : vector<8x1xi1> to vector<8x128xi1>
    %283 = arith.select %282, %276, %248 : vector<8x128xi1>, vector<8x128xf32>
    %284 = vector.shape_cast %280 : vector<8x1xi1> to vector<8x1xi1>
    %285 = vector.broadcast %284 : vector<8x1xi1> to vector<8x128xi1>
    %286 = arith.select %285, %278, %247 : vector<8x128xi1>, vector<8x128xf32>
    %c0_116 = arith.constant 0 : index
    %c0_117 = arith.constant 0 : index
    %287 = vector.load %arg9[%c0_116, %c0_117] : memref<8x128xf32, #tpu.memory_space<vmem>>, vector<8x128xf32>
    tpu.vector_store %arg9[%c0_116, %c0_117], %283 {strides = array<i32>} : memref<8x128xf32, #tpu.memory_space<vmem>>, vector<8x128xf32>,
    %c0_118 = arith.constant 0 : index
    %c0_119 = arith.constant 0 : index
    %288 = vector.load %arg8[%c0_118, %c0_119] : memref<8x128xf32, #tpu.memory_space<vmem>>, vector<8x128xf32>
    tpu.vector_store %arg8[%c0_118, %c0_119], %286 {strides = array<i32>} : memref<8x128xf32, #tpu.memory_space<vmem>>, vector<8x128xf32>,
    %289 = vector.broadcast %246 : vector<8x1xf32> to vector<8x128xf32>
    %290 = arith.mulf %286, %289 : vector<8x128xf32>
    %291 = arith.index_cast %240 : i32 to index
    %c0_120 = arith.constant 0 : index
    %c0_121 = arith.constant 0 : index
    %292 = vector.load %arg6[%291, %c0_120, %c0_121] : memref<8x8x128xf32, #tpu.memory_space<vmem>>, vector<1x8x128xf32>
    %293 = vector.shape_cast %292 : vector<1x8x128xf32> to vector<8x128xf32>
    %294 = vector.shape_cast %290 : vector<8x128xf32> to vector<1x8x128xf32>
    tpu.vector_store %arg6[%291, %c0_120, %c0_121], %294 {strides = array<i32>} : memref<8x8x128xf32, #tpu.memory_space<vmem>>, vector<1x8x128xf32>,
    %c5_i32 = arith.constant 5 : i32
    %c0_i32_122 = arith.constant 0 : i32
    %295 = arith.cmpi eq, %arg0, %c0_i32_122 : i32
    %c7_i32_123 = arith.constant 7 : i32
    %296 = arith.subi %c7_i32_123, %c5_i32 : i32
    %297 = arith.select %295, %c5_i32, %296 : i32
    %298 = arith.index_cast %297 : i32 to index
    %c0_124 = arith.constant 0 : index
    %c0_125 = arith.constant 0 : index
    %299 = vector.load %arg1[%298, %c0_124, %c0_125] : memref<8x8x32xf32, #tpu.memory_space<vmem>>, vector<1x8x32xf32>
    %300 = vector.shape_cast %299 : vector<1x8x32xf32> to vector<8x32xf32>
    %301 = arith.index_cast %297 : i32 to index
    %c0_126 = arith.constant 0 : index
    %c0_127 = arith.constant 0 : index
    %302 = vector.load %arg2[%301, %c0_126, %c0_127] : memref<8x8x1xf32, #tpu.memory_space<vmem>>, vector<1x8x1xf32>
    %303 = vector.shape_cast %302 : vector<1x8x1xf32> to vector<8x1xf32>
    %c0_128 = arith.constant 0 : index
    %c0_129 = arith.constant 0 : index
    %304 = vector.load %arg8[%c0_128, %c0_129] : memref<8x128xf32, #tpu.memory_space<vmem>>, vector<8x128xf32>
    %c0_130 = arith.constant 0 : index
    %c0_131 = arith.constant 0 : index
    %305 = vector.load %arg9[%c0_130, %c0_131] : memref<8x128xf32, #tpu.memory_space<vmem>>, vector<8x128xf32>
    %cst_132 = arith.constant dense<0.000000e+00> : vector<8x512xf32>
    %306 = tpu.matmul %300, %1, %cst_132 {dimension_numbers = #tpu.dot_dimension_numbers<[1], [0], [0], [1], [0, 0, 1, 1], [], []>} : vector<8x32xf32>, vector<32x512xf32>, vector<8x512xf32> -> vector<8x512xf32>
    %cst_133 = arith.constant dense<0.000000e+00> : vector<8x512xf32>
    %307 = tpu.matmul %304, %3, %cst_133 {dimension_numbers = #tpu.dot_dimension_numbers<[1], [0], [0], [1], [0, 0, 1, 1], [], []>} : vector<8x128xf32>, vector<128x512xf32>, vector<8x512xf32> -> vector<8x512xf32>
    %308 = arith.addf %306, %307 : vector<8x512xf32>
    %309 = vector.broadcast %5 : vector<1x512xf32> to vector<8x512xf32>
    %310 = arith.addf %308, %309 : vector<8x512xf32>
    %311 = vector.extract_strided_slice %310 {offsets = [0, 0], sizes = [8, 128], strides = [1, 1]} : vector<8x512xf32> to vector<8x128xf32>
    %312 = arith.negf %311 : vector<8x128xf32>
    %313 = math.exp %312 : vector<8x128xf32>
    %cst_134 = arith.constant 1.000000e+00 : f32
    %314 = vector.broadcast %cst_134 : f32 to vector<8x128xf32>
    %315 = arith.addf %314, %313 : vector<8x128xf32>
    %316 = arith.divf %314, %315 : vector<8x128xf32>
    %317 = vector.extract_strided_slice %310 {offsets = [0, 128], sizes = [8, 128], strides = [1, 1]} : vector<8x512xf32> to vector<8x128xf32>
    %318 = arith.negf %317 : vector<8x128xf32>
    %319 = math.exp %318 : vector<8x128xf32>
    %cst_135 = arith.constant 1.000000e+00 : f32
    %320 = vector.broadcast %cst_135 : f32 to vector<8x128xf32>
    %321 = arith.addf %320, %319 : vector<8x128xf32>
    %322 = arith.divf %320, %321 : vector<8x128xf32>
    %323 = vector.extract_strided_slice %310 {offsets = [0, 256], sizes = [8, 128], strides = [1, 1]} : vector<8x512xf32> to vector<8x128xf32>
    %324 = math.tanh %323 : vector<8x128xf32>
    %325 = vector.extract_strided_slice %310 {offsets = [0, 384], sizes = [8, 128], strides = [1, 1]} : vector<8x512xf32> to vector<8x128xf32>
    %326 = arith.negf %325 : vector<8x128xf32>
    %327 = math.exp %326 : vector<8x128xf32>
    %cst_136 = arith.constant 1.000000e+00 : f32
    %328 = vector.broadcast %cst_136 : f32 to vector<8x128xf32>
    %329 = arith.addf %328, %327 : vector<8x128xf32>
    %330 = arith.divf %328, %329 : vector<8x128xf32>
    %331 = arith.mulf %322, %305 : vector<8x128xf32>
    %332 = arith.mulf %316, %324 : vector<8x128xf32>
    %333 = arith.addf %331, %332 : vector<8x128xf32>
    %334 = math.tanh %333 : vector<8x128xf32>
    %335 = arith.mulf %330, %334 : vector<8x128xf32>
    %cst_137 = arith.constant 0.000000e+00 : f32
    %336 = vector.broadcast %cst_137 : f32 to vector<8x1xf32>
    %337 = arith.cmpf ogt, %303, %336 : vector<8x1xf32>
    %338 = vector.shape_cast %337 : vector<8x1xi1> to vector<8x1xi1>
    %339 = vector.broadcast %338 : vector<8x1xi1> to vector<8x128xi1>
    %340 = arith.select %339, %333, %305 : vector<8x128xi1>, vector<8x128xf32>
    %341 = vector.shape_cast %337 : vector<8x1xi1> to vector<8x1xi1>
    %342 = vector.broadcast %341 : vector<8x1xi1> to vector<8x128xi1>
    %343 = arith.select %342, %335, %304 : vector<8x128xi1>, vector<8x128xf32>
    %c0_138 = arith.constant 0 : index
    %c0_139 = arith.constant 0 : index
    %344 = vector.load %arg9[%c0_138, %c0_139] : memref<8x128xf32, #tpu.memory_space<vmem>>, vector<8x128xf32>
    tpu.vector_store %arg9[%c0_138, %c0_139], %340 {strides = array<i32>} : memref<8x128xf32, #tpu.memory_space<vmem>>, vector<8x128xf32>,
    %c0_140 = arith.constant 0 : index
    %c0_141 = arith.constant 0 : index
    %345 = vector.load %arg8[%c0_140, %c0_141] : memref<8x128xf32, #tpu.memory_space<vmem>>, vector<8x128xf32>
    tpu.vector_store %arg8[%c0_140, %c0_141], %343 {strides = array<i32>} : memref<8x128xf32, #tpu.memory_space<vmem>>, vector<8x128xf32>,
    %346 = vector.broadcast %303 : vector<8x1xf32> to vector<8x128xf32>
    %347 = arith.mulf %343, %346 : vector<8x128xf32>
    %348 = arith.index_cast %297 : i32 to index
    %c0_142 = arith.constant 0 : index
    %c0_143 = arith.constant 0 : index
    %349 = vector.load %arg6[%348, %c0_142, %c0_143] : memref<8x8x128xf32, #tpu.memory_space<vmem>>, vector<1x8x128xf32>
    %350 = vector.shape_cast %349 : vector<1x8x128xf32> to vector<8x128xf32>
    %351 = vector.shape_cast %347 : vector<8x128xf32> to vector<1x8x128xf32>
    tpu.vector_store %arg6[%348, %c0_142, %c0_143], %351 {strides = array<i32>} : memref<8x8x128xf32, #tpu.memory_space<vmem>>, vector<1x8x128xf32>,
    %c6_i32 = arith.constant 6 : i32
    %c0_i32_144 = arith.constant 0 : i32
    %352 = arith.cmpi eq, %arg0, %c0_i32_144 : i32
    %c7_i32_145 = arith.constant 7 : i32
    %353 = arith.subi %c7_i32_145, %c6_i32 : i32
    %354 = arith.select %352, %c6_i32, %353 : i32
    %355 = arith.index_cast %354 : i32 to index
    %c0_146 = arith.constant 0 : index
    %c0_147 = arith.constant 0 : index
    %356 = vector.load %arg1[%355, %c0_146, %c0_147] : memref<8x8x32xf32, #tpu.memory_space<vmem>>, vector<1x8x32xf32>
    %357 = vector.shape_cast %356 : vector<1x8x32xf32> to vector<8x32xf32>
    %358 = arith.index_cast %354 : i32 to index
    %c0_148 = arith.constant 0 : index
    %c0_149 = arith.constant 0 : index
    %359 = vector.load %arg2[%358, %c0_148, %c0_149] : memref<8x8x1xf32, #tpu.memory_space<vmem>>, vector<1x8x1xf32>
    %360 = vector.shape_cast %359 : vector<1x8x1xf32> to vector<8x1xf32>
    %c0_150 = arith.constant 0 : index
    %c0_151 = arith.constant 0 : index
    %361 = vector.load %arg8[%c0_150, %c0_151] : memref<8x128xf32, #tpu.memory_space<vmem>>, vector<8x128xf32>
    %c0_152 = arith.constant 0 : index
    %c0_153 = arith.constant 0 : index
    %362 = vector.load %arg9[%c0_152, %c0_153] : memref<8x128xf32, #tpu.memory_space<vmem>>, vector<8x128xf32>
    %cst_154 = arith.constant dense<0.000000e+00> : vector<8x512xf32>
    %363 = tpu.matmul %357, %1, %cst_154 {dimension_numbers = #tpu.dot_dimension_numbers<[1], [0], [0], [1], [0, 0, 1, 1], [], []>} : vector<8x32xf32>, vector<32x512xf32>, vector<8x512xf32> -> vector<8x512xf32>
    %cst_155 = arith.constant dense<0.000000e+00> : vector<8x512xf32>
    %364 = tpu.matmul %361, %3, %cst_155 {dimension_numbers = #tpu.dot_dimension_numbers<[1], [0], [0], [1], [0, 0, 1, 1], [], []>} : vector<8x128xf32>, vector<128x512xf32>, vector<8x512xf32> -> vector<8x512xf32>
    %365 = arith.addf %363, %364 : vector<8x512xf32>
    %366 = vector.broadcast %5 : vector<1x512xf32> to vector<8x512xf32>
    %367 = arith.addf %365, %366 : vector<8x512xf32>
    %368 = vector.extract_strided_slice %367 {offsets = [0, 0], sizes = [8, 128], strides = [1, 1]} : vector<8x512xf32> to vector<8x128xf32>
    %369 = arith.negf %368 : vector<8x128xf32>
    %370 = math.exp %369 : vector<8x128xf32>
    %cst_156 = arith.constant 1.000000e+00 : f32
    %371 = vector.broadcast %cst_156 : f32 to vector<8x128xf32>
    %372 = arith.addf %371, %370 : vector<8x128xf32>
    %373 = arith.divf %371, %372 : vector<8x128xf32>
    %374 = vector.extract_strided_slice %367 {offsets = [0, 128], sizes = [8, 128], strides = [1, 1]} : vector<8x512xf32> to vector<8x128xf32>
    %375 = arith.negf %374 : vector<8x128xf32>
    %376 = math.exp %375 : vector<8x128xf32>
    %cst_157 = arith.constant 1.000000e+00 : f32
    %377 = vector.broadcast %cst_157 : f32 to vector<8x128xf32>
    %378 = arith.addf %377, %376 : vector<8x128xf32>
    %379 = arith.divf %377, %378 : vector<8x128xf32>
    %380 = vector.extract_strided_slice %367 {offsets = [0, 256], sizes = [8, 128], strides = [1, 1]} : vector<8x512xf32> to vector<8x128xf32>
    %381 = math.tanh %380 : vector<8x128xf32>
    %382 = vector.extract_strided_slice %367 {offsets = [0, 384], sizes = [8, 128], strides = [1, 1]} : vector<8x512xf32> to vector<8x128xf32>
    %383 = arith.negf %382 : vector<8x128xf32>
    %384 = math.exp %383 : vector<8x128xf32>
    %cst_158 = arith.constant 1.000000e+00 : f32
    %385 = vector.broadcast %cst_158 : f32 to vector<8x128xf32>
    %386 = arith.addf %385, %384 : vector<8x128xf32>
    %387 = arith.divf %385, %386 : vector<8x128xf32>
    %388 = arith.mulf %379, %362 : vector<8x128xf32>
    %389 = arith.mulf %373, %381 : vector<8x128xf32>
    %390 = arith.addf %388, %389 : vector<8x128xf32>
    %391 = math.tanh %390 : vector<8x128xf32>
    %392 = arith.mulf %387, %391 : vector<8x128xf32>
    %cst_159 = arith.constant 0.000000e+00 : f32
    %393 = vector.broadcast %cst_159 : f32 to vector<8x1xf32>
    %394 = arith.cmpf ogt, %360, %393 : vector<8x1xf32>
    %395 = vector.shape_cast %394 : vector<8x1xi1> to vector<8x1xi1>
    %396 = vector.broadcast %395 : vector<8x1xi1> to vector<8x128xi1>
    %397 = arith.select %396, %390, %362 : vector<8x128xi1>, vector<8x128xf32>
    %398 = vector.shape_cast %394 : vector<8x1xi1> to vector<8x1xi1>
    %399 = vector.broadcast %398 : vector<8x1xi1> to vector<8x128xi1>
    %400 = arith.select %399, %392, %361 : vector<8x128xi1>, vector<8x128xf32>
    %c0_160 = arith.constant 0 : index
    %c0_161 = arith.constant 0 : index
    %401 = vector.load %arg9[%c0_160, %c0_161] : memref<8x128xf32, #tpu.memory_space<vmem>>, vector<8x128xf32>
    tpu.vector_store %arg9[%c0_160, %c0_161], %397 {strides = array<i32>} : memref<8x128xf32, #tpu.memory_space<vmem>>, vector<8x128xf32>,
    %c0_162 = arith.constant 0 : index
    %c0_163 = arith.constant 0 : index
    %402 = vector.load %arg8[%c0_162, %c0_163] : memref<8x128xf32, #tpu.memory_space<vmem>>, vector<8x128xf32>
    tpu.vector_store %arg8[%c0_162, %c0_163], %400 {strides = array<i32>} : memref<8x128xf32, #tpu.memory_space<vmem>>, vector<8x128xf32>,
    %403 = vector.broadcast %360 : vector<8x1xf32> to vector<8x128xf32>
    %404 = arith.mulf %400, %403 : vector<8x128xf32>
    %405 = arith.index_cast %354 : i32 to index
    %c0_164 = arith.constant 0 : index
    %c0_165 = arith.constant 0 : index
    %406 = vector.load %arg6[%405, %c0_164, %c0_165] : memref<8x8x128xf32, #tpu.memory_space<vmem>>, vector<1x8x128xf32>
    %407 = vector.shape_cast %406 : vector<1x8x128xf32> to vector<8x128xf32>
    %408 = vector.shape_cast %404 : vector<8x128xf32> to vector<1x8x128xf32>
    tpu.vector_store %arg6[%405, %c0_164, %c0_165], %408 {strides = array<i32>} : memref<8x8x128xf32, #tpu.memory_space<vmem>>, vector<1x8x128xf32>,
    %c7_i32_166 = arith.constant 7 : i32
    %c0_i32_167 = arith.constant 0 : i32
    %409 = arith.cmpi eq, %arg0, %c0_i32_167 : i32
    %c7_i32_168 = arith.constant 7 : i32
    %410 = arith.subi %c7_i32_168, %c7_i32_166 : i32
    %411 = arith.select %409, %c7_i32_166, %410 : i32
    %412 = arith.index_cast %411 : i32 to index
    %c0_169 = arith.constant 0 : index
    %c0_170 = arith.constant 0 : index
    %413 = vector.load %arg1[%412, %c0_169, %c0_170] : memref<8x8x32xf32, #tpu.memory_space<vmem>>, vector<1x8x32xf32>
    %414 = vector.shape_cast %413 : vector<1x8x32xf32> to vector<8x32xf32>
    %415 = arith.index_cast %411 : i32 to index
    %c0_171 = arith.constant 0 : index
    %c0_172 = arith.constant 0 : index
    %416 = vector.load %arg2[%415, %c0_171, %c0_172] : memref<8x8x1xf32, #tpu.memory_space<vmem>>, vector<1x8x1xf32>
    %417 = vector.shape_cast %416 : vector<1x8x1xf32> to vector<8x1xf32>
    %c0_173 = arith.constant 0 : index
    %c0_174 = arith.constant 0 : index
    %418 = vector.load %arg8[%c0_173, %c0_174] : memref<8x128xf32, #tpu.memory_space<vmem>>, vector<8x128xf32>
    %c0_175 = arith.constant 0 : index
    %c0_176 = arith.constant 0 : index
    %419 = vector.load %arg9[%c0_175, %c0_176] : memref<8x128xf32, #tpu.memory_space<vmem>>, vector<8x128xf32>
    %cst_177 = arith.constant dense<0.000000e+00> : vector<8x512xf32>
    %420 = tpu.matmul %414, %1, %cst_177 {dimension_numbers = #tpu.dot_dimension_numbers<[1], [0], [0], [1], [0, 0, 1, 1], [], []>} : vector<8x32xf32>, vector<32x512xf32>, vector<8x512xf32> -> vector<8x512xf32>
    %cst_178 = arith.constant dense<0.000000e+00> : vector<8x512xf32>
    %421 = tpu.matmul %418, %3, %cst_178 {dimension_numbers = #tpu.dot_dimension_numbers<[1], [0], [0], [1], [0, 0, 1, 1], [], []>} : vector<8x128xf32>, vector<128x512xf32>, vector<8x512xf32> -> vector<8x512xf32>
    %422 = arith.addf %420, %421 : vector<8x512xf32>
    %423 = vector.broadcast %5 : vector<1x512xf32> to vector<8x512xf32>
    %424 = arith.addf %422, %423 : vector<8x512xf32>
    %425 = vector.extract_strided_slice %424 {offsets = [0, 0], sizes = [8, 128], strides = [1, 1]} : vector<8x512xf32> to vector<8x128xf32>
    %426 = arith.negf %425 : vector<8x128xf32>
    %427 = math.exp %426 : vector<8x128xf32>
    %cst_179 = arith.constant 1.000000e+00 : f32
    %428 = vector.broadcast %cst_179 : f32 to vector<8x128xf32>
    %429 = arith.addf %428, %427 : vector<8x128xf32>
    %430 = arith.divf %428, %429 : vector<8x128xf32>
    %431 = vector.extract_strided_slice %424 {offsets = [0, 128], sizes = [8, 128], strides = [1, 1]} : vector<8x512xf32> to vector<8x128xf32>
    %432 = arith.negf %431 : vector<8x128xf32>
    %433 = math.exp %432 : vector<8x128xf32>
    %cst_180 = arith.constant 1.000000e+00 : f32
    %434 = vector.broadcast %cst_180 : f32 to vector<8x128xf32>
    %435 = arith.addf %434, %433 : vector<8x128xf32>
    %436 = arith.divf %434, %435 : vector<8x128xf32>
    %437 = vector.extract_strided_slice %424 {offsets = [0, 256], sizes = [8, 128], strides = [1, 1]} : vector<8x512xf32> to vector<8x128xf32>
    %438 = math.tanh %437 : vector<8x128xf32>
    %439 = vector.extract_strided_slice %424 {offsets = [0, 384], sizes = [8, 128], strides = [1, 1]} : vector<8x512xf32> to vector<8x128xf32>
    %440 = arith.negf %439 : vector<8x128xf32>
    %441 = math.exp %440 : vector<8x128xf32>
    %cst_181 = arith.constant 1.000000e+00 : f32
    %442 = vector.broadcast %cst_181 : f32 to vector<8x128xf32>
    %443 = arith.addf %442, %441 : vector<8x128xf32>
    %444 = arith.divf %442, %443 : vector<8x128xf32>
    %445 = arith.mulf %436, %419 : vector<8x128xf32>
    %446 = arith.mulf %430, %438 : vector<8x128xf32>
    %447 = arith.addf %445, %446 : vector<8x128xf32>
    %448 = math.tanh %447 : vector<8x128xf32>
    %449 = arith.mulf %444, %448 : vector<8x128xf32>
    %cst_182 = arith.constant 0.000000e+00 : f32
    %450 = vector.broadcast %cst_182 : f32 to vector<8x1xf32>
    %451 = arith.cmpf ogt, %417, %450 : vector<8x1xf32>
    %452 = vector.shape_cast %451 : vector<8x1xi1> to vector<8x1xi1>
    %453 = vector.broadcast %452 : vector<8x1xi1> to vector<8x128xi1>
    %454 = arith.select %453, %447, %419 : vector<8x128xi1>, vector<8x128xf32>
    %455 = vector.shape_cast %451 : vector<8x1xi1> to vector<8x1xi1>
    %456 = vector.broadcast %455 : vector<8x1xi1> to vector<8x128xi1>
    %457 = arith.select %456, %449, %418 : vector<8x128xi1>, vector<8x128xf32>
    %c0_183 = arith.constant 0 : index
    %c0_184 = arith.constant 0 : index
    %458 = vector.load %arg9[%c0_183, %c0_184] : memref<8x128xf32, #tpu.memory_space<vmem>>, vector<8x128xf32>
    tpu.vector_store %arg9[%c0_183, %c0_184], %454 {strides = array<i32>} : memref<8x128xf32, #tpu.memory_space<vmem>>, vector<8x128xf32>,
    %c0_185 = arith.constant 0 : index
    %c0_186 = arith.constant 0 : index
    %459 = vector.load %arg8[%c0_185, %c0_186] : memref<8x128xf32, #tpu.memory_space<vmem>>, vector<8x128xf32>
    tpu.vector_store %arg8[%c0_185, %c0_186], %457 {strides = array<i32>} : memref<8x128xf32, #tpu.memory_space<vmem>>, vector<8x128xf32>,
    %460 = vector.broadcast %417 : vector<8x1xf32> to vector<8x128xf32>
    %461 = arith.mulf %457, %460 : vector<8x128xf32>
    %462 = arith.index_cast %411 : i32 to index
    %c0_187 = arith.constant 0 : index
    %c0_188 = arith.constant 0 : index
    %463 = vector.load %arg6[%462, %c0_187, %c0_188] : memref<8x8x128xf32, #tpu.memory_space<vmem>>, vector<1x8x128xf32>
    %464 = vector.shape_cast %463 : vector<1x8x128xf32> to vector<8x128xf32>
    %465 = vector.shape_cast %461 : vector<8x128xf32> to vector<1x8x128xf32>
    tpu.vector_store %arg6[%462, %c0_187, %c0_188], %465 {strides = array<i32>} : memref<8x8x128xf32, #tpu.memory_space<vmem>>, vector<1x8x128xf32>,
    %c8_i32 = arith.constant 8 : i32
    %c0_189 = arith.constant 0 : index
    %c0_190 = arith.constant 0 : index
    %466 = vector.load %arg8[%c0_189, %c0_190] : memref<8x128xf32, #tpu.memory_space<vmem>>, vector<8x128xf32>
    %c0_191 = arith.constant 0 : index
    %c0_192 = arith.constant 0 : index
    %c0_193 = arith.constant 0 : index
    %467 = vector.load %arg7[%c0_191, %c0_192, %c0_193] : memref<1x8x128xf32, #tpu.memory_space<vmem>>, vector<1x8x128xf32>
    %468 = vector.shape_cast %467 : vector<1x8x128xf32> to vector<8x128xf32>
    %469 = vector.shape_cast %466 : vector<8x128xf32> to vector<1x8x128xf32>
    tpu.vector_store %arg7[%c0_191, %c0_192, %c0_193], %469 {strides = array<i32>} : memref<1x8x128xf32, #tpu.memory_space<vmem>>, vector<1x8x128xf32>,
    return
  }
  func.func @transform_0(%arg0: i32) -> (i32, i32, i32) {
    %c0_i32 = arith.constant 0 : i32
    %c0_i32_0 = arith.constant 0 : i32
    %c0_i32_1 = arith.constant 0 : i32
    %c0_i32_2 = arith.constant 0 : i32
    return %c0_i32, %c0_i32_0, %c0_i32_1 : i32, i32, i32
  }
  func.func @transform_1(%arg0: i32) -> (i32, i32, i32) {
    %c0_i32 = arith.constant 0 : i32
    %c0_i32_0 = arith.constant 0 : i32
    %c0_i32_1 = arith.constant 0 : i32
    %c0_i32_2 = arith.constant 0 : i32
    return %c0_i32, %c0_i32_0, %c0_i32_1 : i32, i32, i32
  }
  func.func @transform_2(%arg0: i32) -> (i32, i32, i32) {
    %c0_i32 = arith.constant 0 : i32
    %c0_i32_0 = arith.constant 0 : i32
    %c0_i32_1 = arith.constant 0 : i32
    return %arg0, %c0_i32, %c0_i32_0 : i32, i32, i32
  }
  func.func @transform_3(%arg0: i32) -> (i32, i32, i32) {
    %c0_i32 = arith.constant 0 : i32
    %c0_i32_0 = arith.constant 0 : i32
    %c0_i32_1 = arith.constant 0 : i32
    return %arg0, %c0_i32, %c0_i32_0 : i32, i32, i32
  }
  func.func @transform_4(%arg0: i32) -> (i32, i32, i32) {
    %c0_i32 = arith.constant 0 : i32
    %c0_i32_0 = arith.constant 0 : i32
    %c0_i32_1 = arith.constant 0 : i32
    return %arg0, %c0_i32, %c0_i32_0 : i32, i32, i32
  }
  func.func @transform_5(%arg0: i32) -> (i32, i32, i32) {
    %c0_i32 = arith.constant 0 : i32
    %c0_i32_0 = arith.constant 0 : i32
    %c0_i32_1 = arith.constant 0 : i32
    return %c0_i32, %c0_i32_0, %arg0 : i32, i32, i32
  }
  func.func @transform_6(%arg0: i32) -> (i32, i32, i32) {
    %c0_i32 = arith.constant 0 : i32
    %c0_i32_0 = arith.constant 0 : i32
    %c0_i32_1 = arith.constant 0 : i32
    return %arg0, %c0_i32, %c0_i32_0 : i32, i32, i32
  }
}

</mosaic_0001>

<bundles_post_ra>
// kernel: tpu_custom_call.1
= control target key start
LH: loop header
LB: loop body
LE: loop exit
PB: predicated region body
PF: predicated region fallthrough
CT: control target
= control target key end

     0   :  { %s5600_s0 = inlined_call_operand.vmem [shape: f32[8,8,32], index: 0, kind: input, shape index: {}]   ;;  %s5601_s1 = inlined_call_operand.vmem [shape: f32[8,8,1], index: 1, kind: input, shape index: {}]   ;;  %s5602_s2 = inlined_call_operand.hbm [shape: f32[2,32,512], index: 2, kind: input, shape index: {}]   ;;  %s5603_s3 = inlined_call_operand.hbm [shape: f32[2,128,512], index: 3, kind: input, shape index: {}]   ;;  %s5604_s4 = inlined_call_operand.vmem [shape: f32[2,1,512], index: 4, kind: input, shape index: {}]   ;;  %s5605_s5 = inlined_call_operand.hbm [shape: f32[8,8,256], index: 5, kind: output, shape index: {0}]   ;;  %s5606_s6 = inlined_call_operand.hbm [shape: f32[2,8,128], index: 6, kind: output, shape index: {1}]  }
   0x1   :  { %5612 = sst [smem:[#allocation20_spill]] %s5602_s2 }
   0x2   :  { %12 = vsyncpa [#allocation5], 0 }
   0x3   :  { %14 = vsyncpa [#allocation5 + $0x1], 0 }
   0x4   :  { %15 = vsyncpa [#allocation8], 0 }
   0x5   :  { %17 = vsyncpa [#allocation8 + $0x1], 0 }
   0x6   :  { %18 = vsyncpa [#allocation6], 0 }
   0x7   :  { %20 = vsyncpa [#allocation6 + $0x1], 0 }
   0x8   :  { %21 = vsyncpa [#allocation11], 0 }
   0x9   :  { %23 = vsyncpa [#allocation11 + $0x1], 0  ;;  %s4541_s21 = smov 0   ;;  %s4543_s22 = smov 0  }
   0xa   :  { %s4545_s23 = smov 0   ;;  %s4547_s24 = smov 0  }
   0xb LB: > { %s4562_s25 = sadd.s32 4294967295, %s4493_s24   ;;  %s3393_s26 = sadd.s32 4294967294, %s4493_s24   ;;  %s4493_s24 = sphi %s4547_s24, %s5644_s24   ;;  %s4489_s23 = sphi %s4545_s23, %s5643_s23   ;;  %s4485_s22 = sphi %s4543_s22, %s5642_s22   ;;  %s4481_s21 = sphi %s4541_s21, %s5641_s21  }
   0xc   : > { %s4566_s27 = sadd.s32 1, %s4493_s24   ;;  %s78_s28 = sadd.s32 1, %s4489_s23 }
   0xd   : > { %s75_s29 = ssub.s32 %s4493_s24, %s4566_s27  ;;  %p85_p0 = scmp.ne.s32.totalorder %s4489_s23, %s4485_s22 }
   0xe   : > { %p76_p1 = scmp.eq.s32.totalorder %s75_s29, 0  ;;  %p86_p2 = scmp.eq.s32.totalorder %s4493_s24, 0 }
   0xf   : > { %p91_p3 = scmp.ne.s32.totalorder %s4485_s22, %s4481_s21  ;;  %p5607_p4 = scmp.eq.s32.totalorder %s4562_s25, 0 }
  0x10   : > { %s4578_s30 = scalar_select %p76_p1, %s4489_s23, %s78_s28  }
  0x11   : > { %p4580_p5 = por %p86_p2, %p85_p0  ;;  %p4586_p6 = por %p5607_p4, %p91_p3 }
  0x12   : > { %p167_p7 = scmp.eq.s32.totalorder %s4562_s25, 1  ;;  %p173_p8 = scmp.eq.s32.totalorder %s3393_s26, 1 }
  0x13   : > { %s5614_s8 = scalar_select %p4586_p6, 1, 0 }
  0x14   : > { %p4160_p10 = scmp.lt.s32.totalorder %s4493_s24, 2  ;;  %p4593_p11 = por %p167_p7, %p85_p0 }
  0x15   : > { %p4597_p12 = por %p173_p8, %p91_p3  ;;  %s4602_s11 = sand.u32 1, %s4489_s23  }
  0x16   : > { %s5615_s9 = scalar_select %p4593_p11, 1, 0 }
  0x17   : > { %s5616_s10 = scalar_select %p4597_p12, 1, 0 }
  0x18   : > { %s3462_s12 = sshll.u32 %s4493_s24, 11  ;;  %s3396_s13 = sshll.u32 %s4602_s11, 7 }
  0x19   : > { %s5617_s2 = sld [smem:[#allocation20_spill]]  ;;  %s229_s17 = scalar_lea.vmem [#allocation4], %s3396_s13 }
  0x1a   : > { %s236_s18 = sshll.u32 %s229_s17, 4  ;;  %p4613_p13 = pnand %p4160_p10, %p4580_p5  ;;  %s4617_s18 = int_to_ptr.vmem [resolvable:$true] %s236_s18 }
  0x1b   : > { %s226_s20 = scalar_lea.sflag [#allocation5], %s4602_s11 }
  0x1c   : > { %p4333_p1 = pneg %p4613_p13 }
  0x1f   : > { %s4609_s16 = scalar_lea.hbm %s5617_s2, %s3462_s12  ;;  %s4336_s7 = scalar_lea.hbm %s5617_s2, 4096 }
  0x20   : > { %s4331_s26 = scalar_lea.hbm %s4609_s16, 2048  ;;  %p4337_p5 = scmp.lt.u32.totalorder %s4609_s16, %s5617_s2 }
  0x21   : > { %p4332_p0 = scmp.ne.s32.totalorder %s4609_s16, %s4331_s26  ;;  %p4338_p7 = scmp.lt.u32.totalorder %s4336_s7, %s4331_s26 }
  0x22   : > { %p4340_p10 = scmp.lt.u32.totalorder %s4331_s26, %s4609_s16 }
  0x23   : > { %p4334_p2 = pnand %p4333_p1, %p4332_p0  ;;  %p4339_p8 = por %p4338_p7, %p4337_p5 }
  0x25   : > { %p4335_p3 = pneg %p4334_p2  ;;  %p4341_p9 = por %p4340_p10, %p4339_p8 }
  0x27   : > { %p4342_p4 = pnand %p4341_p9, %p4335_p3 }
  0x29   : > { %4345 = shalt.err (!%p4342_p4)
}
  0x2a   : > { %s4346_s14 = scalar_lea.vmem %s4617_s18, 2048  ;;  %s4495_s15 = smov [#allocation4]  }
  0x2b   : > { %p4347_p0 = scmp.ne.s32.totalorder %s4617_s18, %s4346_s14  ;;  %s4351_s17 = sshll.u32 %s4495_s15, 4  ;;  %s4352_s17 = int_to_ptr.vmem [resolvable:$false] %s4351_s17 }
  0x2c   : > { %s4353_s28 = scalar_lea.vmem %s4352_s17, 4096  ;;  %p4354_p11 = scmp.lt.s32.totalorder %s4617_s18, %s4352_s17 }
  0x2d   : > { %p4349_p2 = pnand %p4347_p0, %p4333_p1  ;;  %p4355_p5 = scmp.lt.s32.totalorder %s4353_s28, %s4346_s14 }
  0x2f   : > { %p4350_p12 = pneg %p4349_p2  ;;  %p4356_p7 = por %p4355_p5, %p4354_p11 }
  0x31   : > { %p4357_p8 = pnand %p4356_p7, %p4350_p12 }
  0x33   : > { %4360 = shalt.err (!%p4357_p8)
}
  0x34   : > { %s4496_s26 = smov 512   ;;  %s4497_s29 = smov 32  }
  0x35   : > { %4149 = dma.hbm_to_vmem [thread:$0]  (!%p4613_p13), %s4609_s16, 2048, %s4617_s18, %s226_s20, %s4496_s26, %s4496_s26, %s4497_s29  }
  0x36   : > { %p3402_p4 = scmp.ge.s32.totalorder %s4493_s24, 1  ;;  %p272_p9 = scmp.lt.s32.totalorder %s4493_s24, 3 }
  0x37   : > { %s3399_s7 = sshll.u32 %s4602_s11, 9  ;;  %s3463_s13 = sshll.u32 %s4493_s24, 13 }
  0x38   : > { %p4653_p11 = pnand %p3402_p4, %p272_p9  ;;  %s250_s14 = scalar_lea.vmem [#allocation7], %s3399_s7 }
  0x39   : > { %s257_s15 = sshll.u32 %s250_s14, 4  ;;  %s4661_s2 = scalar_lea.hbm %s5603_s3, %s3463_s13  ;;  %s4663_s15 = int_to_ptr.vmem [resolvable:$true] %s257_s15 }
  0x3a   : > { %s247_s16 = scalar_lea.sflag [#allocation8], %s4602_s11  ;;  %s4361_s18 = scalar_lea.hbm %s4661_s2, 8192 }
  0x3b   : > { %p4362_p12 = scmp.ne.s32.totalorder %s4661_s2, %s4361_s18  ;;  %s4366_s14 = scalar_lea.hbm %s5603_s3, 16384 }
  0x3c   : > { %p4367_p0 = scmp.lt.u32.totalorder %s4661_s2, %s5603_s3  ;;  %p4368_p2 = scmp.lt.u32.totalorder %s4366_s14, %s4361_s18 }
  0x3d   : > { %p4364_p3 = pnand %p4362_p12, %p4333_p1  ;;  %p4370_p7 = scmp.lt.u32.totalorder %s4361_s18, %s4661_s2 }
  0x3e   : > { %p4369_p5 = por %p4368_p2, %p4367_p0 }
  0x3f   : > { %p4365_p10 = pneg %p4364_p3 }
  0x40   : > { %p4371_p8 = por %p4370_p7, %p4369_p5 }
  0x42   : > { %p4372_p4 = pnand %p4371_p8, %p4365_p10 }
  0x44   : > { %4375 = shalt.err (!%p4372_p4)
}
  0x45   : > { %s4376_s28 = scalar_lea.vmem %s4663_s15, 8192  ;;  %s4498_s20 = smov [#allocation7]  }
  0x46   : > { %p4377_p9 = scmp.ne.s32.totalorder %s4663_s15, %s4376_s28  ;;  %s4381_s7 = sshll.u32 %s4498_s20, 4  ;;  %s4382_s7 = int_to_ptr.vmem [resolvable:$false] %s4381_s7 }
  0x47   : > { %s4383_s17 = scalar_lea.vmem %s4382_s7, 16384  ;;  %p4384_p6 = scmp.lt.s32.totalorder %s4663_s15, %s4382_s7 }
  0x48   : > { %p4379_p12 = pnand %p4377_p9, %p4333_p1  ;;  %p4385_p0 = scmp.lt.s32.totalorder %s4383_s17, %s4376_s28 }
  0x4a   : > { %p4380_p3 = pneg %p4379_p12  ;;  %p4386_p2 = por %p4385_p0, %p4384_p6 }
  0x4c   : > { %p4387_p5 = pnand %p4386_p2, %p4380_p3 }
  0x4e   : > { %4390 = shalt.err (!%p4387_p5)
}
  0x4f   : > { %4152 = dma.hbm_to_vmem [thread:$0]  (!%p4613_p13), %s4661_s2, 8192, %s4663_s15, %s247_s16, %s4496_s26, %s4496_s26, %s4497_s29  }
  0x50   : > { %276 = sbr.rel (%p4653_p11) target bundleno = 2304 (0x900), region = 40 }
  0x57   : > { %s4697_s18 = sand.u32 1, %s4485_s22   ;;  %p5620_p6 = scmp.ne.s32.totalorder %s5614_s8, 0 }
  0x58   : > { %s3403_s14 = sshll.u32 %s4697_s18, 7  ;;  %s279_s13 = scalar_lea.sflag [#allocation5], %s4697_s18 }
  0x59   : > { %s4701_s19 = scalar_lea.vmem [#allocation4], %s3403_s14 }
  0x5a   : > { %4464 = dma.done.wait (%p5620_p6), %s279_s13, 2048  }
  0x5b   : > { %4466 = vsyncadd (%p5620_p6), %s279_s13, 4294965248  ;;  %s3404_s2 = sshll.u32 %s4697_s18, 9  ;;  %s288_s11 = scalar_lea.sflag [#allocation8], %s4697_s18 }
  0x5c   : > { %s4709_s26 = scalar_lea.vmem [#allocation7], %s3404_s2 }
  0x5d   : > { %4468 = dma.done.wait (%p5620_p6), %s288_s11, 8192  }
  0x5e   : > { %4470 = vsyncadd (%p5620_p6), %s288_s11, 4294959104  ;;  %v5610_v0 = vmov 0.0   ;;  %v4500_v1 = vmov 0   ;;  %v355_v2 = vld [vmem:[%s4709_s26 + $0x8] sm:$0xff]  ;;  %v354_v4 = vld [vmem:[%s4709_s26] sm:$0xff]  ;;  %p5621_p13 = scmp.eq.s32.totalorder %s4562_s25, 0 }
  0x5f   : > { %494 = vmatprep.mubr.f32.mxu0 %v5610_v0  ;;  %565 = vmatprep.mubr.f32.mxu1 %v5610_v0  ;;  %v359_v3 = vld [vmem:[%s4709_s26 + $0x28] sm:$0xff]  ;;  %v358_v6 = vld [vmem:[%s4709_s26 + $0x20] sm:$0xff]  ;;  %v357_v13 = vld [vmem:[%s4709_s26 + $0x18] sm:$0xff]  ;;  %vm572_vm4 = vcmask 261120   ;;  %p334_p12 = scmp.lt.s32.totalorder %s4562_s25, 1  ;;  %s3405_s13 = sshll.u32 %s4697_s18, 6 }
  0x60   : > { %4201 = vset.pattern.permute.xlu0 %v4500_v1  ;;  %4202 = vset.pattern.permute.xlu1 %v4500_v1  ;;  %v4722_v5 = vpack.c.bf16 %v359_v3, %v355_v2  ;;  %v363_v7 = vld [vmem:[%s4709_s26 + $0x48] sm:$0xff]  ;;  %v4727_v9 = vpack.c.bf16 %v358_v6, %v354_v4  ;;  %v362_v11 = vld [vmem:[%s4709_s26 + $0x40] sm:$0xff]  ;;  %v361_v14 = vld [vmem:[%s4709_s26 + $0x38] sm:$0xff]  ;;  %s785_s8 = scalar_select %p5621_p13, 1, 6 }
  0x61   : > { %v367_v8 = vld [vmem:[%s4709_s26 + $0x68] sm:$0xff]  ;;  %v366_v12 = vld [vmem:[%s4709_s26 + $0x60] sm:$0xff]  ;;  %v4741_v18 = vpack.c.bf16 %v361_v14, %v357_v13  ;;  %v356_v19 = vld [vmem:[%s4709_s26 + $0x10] sm:$0xff]  ;;  %p5622_p1 = pmov %p5621_p13  ;;  %p5638_p0 = scmp.ne.s32.totalorder %s5615_s9, 0 }
  0x62   : > { %v4729_v10 = vpack.c.bf16 %v367_v8, %v363_v7  ;;  %3467 = vmatprep.subr.bf16.mxu0 %v4722_v5  ;;  %v371_v15 = vld [vmem:[%s4709_s26 + $0x88] sm:$0xff]  ;;  %v4739_v17 = vpack.c.bf16 %v366_v12, %v362_v11  ;;  %v360_v20 = vld [vmem:[%s4709_s26 + $0x30] sm:$0xff]  ;;  %v370_v21 = vld [vmem:[%s4709_s26 + $0x80] sm:$0xff]  ;;  %s4847_s15 = sshll.u32 %s785_s8, 3 }
  0x63   : > { %v375_v16 = vld [vmem:[%s4709_s26 + $0xa8] sm:$0xff]  ;;  %3469 = vmatpush1.bf16.msra.mxu0 %v4727_v9  ;;  %v4749_v23 = vpack.c.bf16 %v360_v20, %v356_v19  ;;  %v374_v24 = vld [vmem:[%s4709_s26 + $0xa0] sm:$0xff]  ;;  %v365_v25 = vld [vmem:[%s4709_s26 + $0x58] sm:$0xff]  ;;  %3499 = vmatprep.subr.bf16.mxu1 %v4741_v18  ;;  %s422_s29 = scalar_select %p5622_p1, 0, 7 }
  0x64   : > { %3471 = vmatprep.subr.bf16.mxu0 %v4729_v10  ;;  %v4747_v22 = vpack.c.bf16 %v375_v16, %v371_v15  ;;  %v369_v26 = vld [vmem:[%s4709_s26 + $0x78] sm:$0xff]  ;;  %v379_v28 = vld [vmem:[%s4709_s26 + $0xc8] sm:$0xff]  ;;  %v364_v30 = vld [vmem:[%s4709_s26 + $0x50] sm:$0xff]  ;;  %v4763_v32 = vpack.c.bf16 %v374_v24, %v370_v21  ;;  %p5623_p11 = pmov %p5622_p1  ;;  %p5624_p10 = pmov %p5622_p1 }
  0x65   : > { %v4755_v27 = vpack.c.bf16 %v369_v26, %v365_v25  ;;  %v383_v29 = vld [vmem:[%s4709_s26 + $0xe8] sm:$0xff]  ;;  %3501 = vmatpush1.bf16.msra.mxu1 %v4749_v23  ;;  %v368_v31 = vld [vmem:[%s4709_s26 + $0x70] sm:$0xff]  ;;  %v378_v34 = vld [vmem:[%s4709_s26 + $0xc0] sm:$0xff]  ;;  %s4856_s28 = sshll.u32 %s422_s29, 3  ;;  %s789_s11 = scalar_lea.vmem %s5601_s1, %s4847_s15 }
  0x66   : > { %v4766_v33 = vpack.c.bf16 %v368_v31, %v364_v30  ;;  %v373_v35 = vld [vmem:[%s4709_s26 + $0x98] sm:$0xff]  ;;  %v4772_v37 = vpack.c.bf16 %v383_v29, %v379_v28  ;;  %v382_v38 = vld [vmem:[%s4709_s26 + $0xe0] sm:$0xff]  ;;  %v372_v40 = vld [vmem:[%s4709_s26 + $0x90] sm:$0xff]  ;;  %s1808_s12 = scalar_select %p5623_p11, 4, 3 }
  0x67   : > { %3473 = vmatpush1.bf16.msra.mxu0 %v4739_v17  ;;  %3503 = vmatprep.subr.bf16.mxu1 %v4755_v27  ;;  %v377_v36 = vld [vmem:[%s4709_s26 + $0xb8] sm:$0xff]  ;;  %v376_v41 = vld [vmem:[%s4709_s26 + $0xb0] sm:$0xff]  ;;  %v387_v42 = vld [vmem:[%s4709_s26 + $0x108] sm:$0xff]  ;;  %v4787_v47 = vpack.c.bf16 %v382_v38, %v378_v34  ;;  %s2490_s16 = scalar_select %p5624_p10, 6, 1 }
  0x68   : > { %3475 = vmatprep.subr.bf16.mxu0 %v4747_v22  ;;  %v4775_v39 = vpack.c.bf16 %v377_v36, %v373_v35  ;;  %v391_v43 = vld [vmem:[%s4709_s26 + $0x128] sm:$0xff]  ;;  %v381_v44 = vld [vmem:[%s4709_s26 + $0xd8] sm:$0xff]  ;;  %v4783_v45 = vpack.c.bf16 %v376_v41, %v372_v40  ;;  %v386_v48 = vld [vmem:[%s4709_s26 + $0x100] sm:$0xff]  ;;  %s4858_s20 = sshll.u32 %s1808_s12, 3  ;;  %s426_s14 = scalar_lea.vmem %s5601_s1, %s4856_s28 }
  0x69   : > { %3505 = vmatpush1.bf16.msra.mxu1 %v4766_v33  ;;  %v385_v46 = vld [vmem:[%s4709_s26 + $0xf8] sm:$0xff]  ;;  %v380_v50 = vld [vmem:[%s4709_s26 + $0xd0] sm:$0xff]  ;;  %v4796_v52 = vpack.c.bf16 %v391_v43, %v387_v42  ;;  %v390_v53 = vld [vmem:[%s4709_s26 + $0x120] sm:$0xff]  ;;  %s1812_s12 = scalar_lea.vmem %s5601_s1, %s4858_s20  ;;  %s4896_s7 = sshll.u32 %s2490_s16, 3 }
  0x6a   : > { %3507 = vmatprep.subr.bf16.mxu1 %v4775_v39  ;;  %v4791_v49 = vpack.c.bf16 %v385_v46, %v381_v44  ;;  %v384_v51 = vld [vmem:[%s4709_s26 + $0xf0] sm:$0xff]  ;;  %v389_v54 = vld [vmem:[%s4709_s26 + $0x118] sm:$0xff]  ;;  %v395_v56 = vld [vmem:[%s4709_s26 + $0x148] sm:$0xff]  ;;  %v4807_v59 = vpack.c.bf16 %v390_v53, %v386_v48  ;;  %s2494_s17 = scalar_lea.vmem %s5601_s1, %s4896_s7  ;;  %s424_s2 = scalar_lea.vmem %s5600_s0, %s4856_s28 }
  0x6b   : > { %3477 = vmatpush1.bf16.msra.mxu0 %v4763_v32  ;;  %v393_v55 = vld [vmem:[%s4709_s26 + $0x138] sm:$0xff]  ;;  %v399_v57 = vld [vmem:[%s4709_s26 + $0x168] sm:$0xff]  ;;  %v4804_v58 = vpack.c.bf16 %v384_v51, %v380_v50  ;;  %v394_v60 = vld [vmem:[%s4709_s26 + $0x140] sm:$0xff]  ;;  %p5625_p7 = pmov %p5622_p1  ;;  %p5626_p8 = pmov %p5622_p1 }
  0x6c   : > { %3479 = vmatprep.subr.bf16.mxu0 %v4772_v37  ;;  %v4811_v61 = vpack.c.bf16 %v393_v55, %v389_v54  ;;  %v388_v62 = vld [vmem:[%s4709_s26 + $0x110] sm:$0xff]  ;;  %v4816_v2 = vpack.c.bf16 %v399_v57, %v395_v56  ;;  %v398_v3 = vld [vmem:[%s4709_s26 + $0x160] sm:$0xff]  ;;  %v397_v4 = vld [vmem:[%s4709_s26 + $0x158] sm:$0xff]  ;;  %p5627_p4 = pmov %p5622_p1  ;;  %p5628_p9 = pmov %p5622_p1 }
  0x6d   : > { %3509 = vmatpush1.bf16.msra.mxu1 %v4783_v45  ;;  %v392_v63 = vld [vmem:[%s4709_s26 + $0x130] sm:$0xff]  ;;  %v401_v6 = vld [vmem:[%s4709_s26 + $0x178] sm:$0xff]  ;;  %v403_v7 = vld [vmem:[%s4709_s26 + $0x188] sm:$0xff]  ;;  %v4833_v12 = vpack.c.bf16 %v398_v3, %v394_v60  ;;  %s335_s8 = scalar_select %p334_p12, %s4562_s25, 1 }
  0x6e   : > { %3511 = vmatprep.subr.bf16.mxu1 %v4791_v49  ;;  %v407_v8 = vld [vmem:[%s4709_s26 + $0x1a8] sm:$0xff]  ;;  %v4828_v11 = vpack.c.bf16 %v392_v63, %v388_v62  ;;  %v402_v13 = vld [vmem:[%s4709_s26 + $0x180] sm:$0xff]  ;;  %v4837_v14 = vpack.c.bf16 %v401_v6, %v397_v4  ;;  %v396_v15 = vld [vmem:[%s4709_s26 + $0x150] sm:$0xff]  ;;  %s2149_s16 = scalar_select %p5627_p4, 5, 2 }
  0x6f   : > { %3481 = vmatpush1.bf16.msra.mxu0 %v4787_v47  ;;  %v400_v16 = vld [vmem:[%s4709_s26 + $0x170] sm:$0xff]  ;;  %v4842_v19 = vpack.c.bf16 %v407_v8, %v403_v7  ;;  %v406_v20 = vld [vmem:[%s4709_s26 + $0x1a0] sm:$0xff]  ;;  %v405_v21 = vld [vmem:[%s4709_s26 + $0x198] sm:$0xff]  ;;  %s3407_s29 = sshll.u32 %s335_s8, 2 }
  0x70   : > { %3483 = vmatprep.subr.bf16.mxu0 %v4796_v52  ;;  %v409_v24 = vld [vmem:[%s4709_s26 + $0x1b8] sm:$0xff]  ;;  %v411_v25 = vld [vmem:[%s4709_s26 + $0x1c8] sm:$0xff]  ;;  %v4854_v28 = vpack.c.bf16 %v400_v16, %v396_v15  ;;  %v4861_v29 = vpack.c.bf16 %v406_v20, %v402_v13  ;;  %v410_v30 = vld [vmem:[%s4709_s26 + $0x1c0] sm:$0xff] }
  0x71   : > { %3513 = vmatpush1.bf16.msra.mxu1 %v4804_v58  ;;  %v415_v26 = vld [vmem:[%s4709_s26 + $0x1e8] sm:$0xff]  ;;  %v4865_v31 = vpack.c.bf16 %v409_v24, %v405_v21  ;;  %v404_v34 = vld [vmem:[%s4709_s26 + $0x190] sm:$0xff]  ;;  %v414_v38 = vld [vmem:[%s4709_s26 + $0x1e0] sm:$0xff] }
  0x72   : > { %3515 = vmatprep.subr.bf16.mxu1 %v4811_v61  ;;  %v408_v35 = vld [vmem:[%s4709_s26 + $0x1b0] sm:$0xff]  ;;  %v4878_v36 = vpack.c.bf16 %v415_v26, %v411_v25  ;;  %v413_v40 = vld [vmem:[%s4709_s26 + $0x1d8] sm:$0xff]  ;;  %v339_v42 = vld [vmem:[%s4701_s19 + $0x8] sm:$0xff]  ;;  %v4899_v50 = vpack.c.bf16 %v414_v38, %v410_v30 }
  0x73   : > { %3485 = vmatpush1.bf16.msra.mxu0 %v4807_v59  ;;  %v417_v41 = vld [vmem:[%s4709_s26 + $0x1f8] sm:$0xff]  ;;  %v343_v43 = vld [vmem:[%s4701_s19 + $0x28] sm:$0xff]  ;;  %v4890_v44 = vpack.c.bf16 %v408_v35, %v404_v34  ;;  %v4892_v46 = vld [vmem:[%s426_s14] sm:$0xff] }
  0x74   : > { %3487 = vmatprep.subr.bf16.mxu0 %v4816_v2  ;;  %v4894_v48 = vld [vmem:[%s789_s11] sm:$0xff]  ;;  %v4903_v53 = vpack.c.bf16 %v417_v41, %v413_v40  ;;  %v412_v54 = vld [vmem:[%s4709_s26 + $0x1d0] sm:$0xff]  ;;  %vm767_vm0 = vcmp.gt.f32.partialorder %v4892_v46, 0.0  ;;  %v4910_v56 = vpack.c.bf16 %v343_v43, %v339_v42  ;;  %v347_v60 = vld [vmem:[%s4701_s19 + $0x48] sm:$0xff]  ;;  %s1126_s11 = scalar_select %p5625_p7, 2, 5 }
  0x75   : > { %3517 = vmatpush1.bf16.msra.mxu1 %v4828_v11  ;;  %v338_v51 = vld [vmem:[%s4701_s19] sm:$0xff]  ;;  %v416_v55 = vld [vmem:[%s4709_s26 + $0x1f0] sm:$0xff]  ;;  %vm1108_vm1 = vcmp.gt.f32.partialorder %v4894_v48, 0.0  ;;  %v768_v62 = vsel %vm767_vm0, 1, %v4500_v1  ;;  %v351_v3 = vld [vmem:[%s4701_s19 + $0x68] sm:$0xff] }
  0x76   : > { %3519 = vmatprep.subr.bf16.mxu1 %v4837_v14  ;;  %v342_v57 = vld [vmem:[%s4701_s19 + $0x20] sm:$0xff]  ;;  %v341_v4 = vld [vmem:[%s4701_s19 + $0x18] sm:$0xff]  ;;  %770 = vperm.xlu0 %4201, %v768_v62   ;;  %v4925_v7 = vpack.c.bf16 %v416_v55, %v412_v54  ;;  %v1109_v13 = vsel %vm1108_vm1, 1, %v4500_v1  ;;  %v340_v20 = vld [vmem:[%s4701_s19 + $0x10] sm:$0xff]  ;;  %v4938_v24 = vpack.c.bf16 %v351_v3, %v347_v60  ;;  %s1467_s26 = scalar_select %p5626_p8, 3, 4 }
  0x77   : > { %3489 = vmatpush1.bf16.msra.mxu0 %v4833_v12  ;;  %v4915_v63 = vld [vmem:[%s1812_s12] sm:$0xff]  ;;  %v345_v6 = vld [vmem:[%s4701_s19 + $0x38] sm:$0xff]  ;;  %v4930_v15 = vpack.c.bf16 %v342_v57, %v338_v51  ;;  %v344_v21 = vld [vmem:[%s4701_s19 + $0x30] sm:$0xff] }
  0x78   : > { %3491 = vmatprep.subr.bf16.mxu0 %v4842_v19  ;;  %v346_v8 = vld [vmem:[%s4701_s19 + $0x40] sm:$0xff]  ;;  %vm2131_vm2 = vcmp.gt.f32.partialorder %v4915_v63, 0.0  ;;  %v4940_v25 = vpack.c.bf16 %v345_v6, %v341_v4  ;;  %v349_v26 = vld [vmem:[%s4701_s19 + $0x58] sm:$0xff]  ;;  %v4946_v35 = vpack.c.bf16 %v344_v21, %v340_v20  ;;  %v348_v42 = vld [vmem:[%s4701_s19 + $0x50] sm:$0xff] }
  0x79   : > { %3521 = vmatpush1.bf16.msra.mxu1 %v4854_v28  ;;  %v350_v16 = vld [vmem:[%s4701_s19 + $0x60] sm:$0xff]  ;;  %v353_v30 = vld [vmem:[%s4701_s19 + $0x78] sm:$0xff]  ;;  %v2132_v38 = vsel %vm2131_vm2, 1, %v4500_v1  ;;  %v352_v43 = vld [vmem:[%s4701_s19 + $0x70] sm:$0xff]  ;;  %s4973_s19 = sshll.u32 %s1126_s11, 3  ;;  %s5031_s11 = sshll.u32 %s2149_s16, 3 }
  0x7a   : > { %3523 = vmatprep.subr.bf16.mxu1 %v4865_v31  ;;  %v2495_v34 = vld [vmem:[%s2494_s17] sm:$0xff]  ;;  %1111 = vperm.xlu0 %4201, %v1109_v13   ;;  %v4950_v40 = vpack.c.bf16 %v350_v16, %v346_v8  ;;  %v4957_v41 = vpack.c.bf16 %v353_v30, %v349_v26  ;;  %v4967_v51 = vpack.c.bf16 %v352_v43, %v348_v42  ;;  %s1130_s12 = scalar_lea.vmem %s5601_s1, %s4973_s19  ;;  %s5025_s17 = sshll.u32 %s1467_s26, 3  ;;  %v719_v8 = vlaneseq }
  0x7b   : > { %3493 = vmatpush1.bf16.msra.mxu0 %v4861_v29  ;;  %vm2813_vm3 = vcmp.gt.f32.partialorder %v2495_v34, 0.0  ;;  %v425_v55 = vld [vmem:[%s424_s2] sm:$0xff]  ;;  %s1471_s2 = scalar_lea.vmem %s5601_s1, %s5025_s17  ;;  %s337_s16 = scalar_lea.vmem %s5604_s4, %s3407_s29 }
  0x7c   : > { %3495 = vmatprep.subr.bf16.mxu0 %v4878_v36  ;;  %v2814_v54 = vsel %vm2813_vm3, 1, %v4500_v1  ;;  %v1131_v57 = vld [vmem:[%s1130_s12] sm:$0xff]  ;;  %s2153_s12 = scalar_lea.vmem %s5601_s1, %s5031_s11  ;;  %v720_v13 = vshrl.u32 %v719_v8, 7 }
  0x7d   : > { %3525 = vmatpush1.bf16.msra.mxu1 %v4890_v44  ;;  %vm1449_vm5 = vcmp.gt.f32.partialorder %v1131_v57, 0.0  ;;  %v1472_v60 = vld [vmem:[%s1471_s2] sm:$0xff]  ;;  %s2831_s26 = scalar_select %p5628_p9, 7, 0 }
  0x7e   : > { %3527 = vmatprep.subr.bf16.mxu1 %v4903_v53  ;;  %2134 = vperm.xlu0 %4201, %v2132_v38   ;;  %vm1790_vm6 = vcmp.gt.f32.partialorder %v1472_v60, 0.0  ;;  %v721_v16 = vsub.s32 0, %v720_v13  ;;  %v418_v20 = vld [vmem:[%s337_s16] sm:$0xf]  ;;  %v725_v21 = vsub.s32 1, %v720_v13  ;;  %v733_v30 = vsub.s32 3, %v720_v13  ;;  %s1810_s16 = scalar_lea.vmem %s5600_s0, %s4858_s20 }
  0x7f   : > { %3497 = vmatpush1.bf16.msra.mxu0 %v4899_v50  ;;  %v1791_v62 = vsel %vm1790_vm6, 1, %v4500_v1  ;;  %s5041_s14 = sshll.u32 %s2831_s26, 3 }
  0x80   : > { %3531 = vmatprep.subr.bf16.mxu0 %v4910_v56  ;;  %s2835_s2 = scalar_lea.vmem %s5601_s1, %s5041_s14  ;;  %v5054_v26 = vrot.slane %v418_v20, %v721_v16 }
  0x81   : > { %3529 = vmatpush1.bf16.msra.mxu1 %v4925_v7  ;;  %v2836_v4 = vld [vmem:[%s2835_s2] sm:$0xff]  ;;  %s5076_s2 = scalar_lea.vmem [#allocation9], %s3405_s13  ;;  %s1128_s13 = scalar_lea.vmem %s5600_s0, %s4973_s19 }
  0x82   : > { %495 = vmatmul.mubr.f32.vlgmr.msra.gmra.mrb[0].mxu0 %v5610_v0  ;;  %3539 = vmatprep.subr.bf16.mxu1 %v4940_v25  ;;  %vm3154_vm8 = vcmp.gt.f32.partialorder %v2836_v4, 0.0  ;;  %s783_s8 = scalar_lea.vmem %s5076_s2, %s4856_s28 [#allocation9]  ;;  %s1124_s26 = scalar_lea.vmem %s5076_s2, %s4847_s15 [#allocation9] }
  0x83   : > { %3533 = vmatpush1.bf16.msra.mxu0 %v4930_v15  ;;  %640 = vmatprep.mubr.f32.mxu0 %v5610_v0  ;;  %v3155_v6 = vsel %vm3154_vm8, 1, %v4500_v1  ;;  %s1469_s28 = scalar_lea.vmem %s5600_s0, %s5025_s17 }
  0x84   : > { %3535 = vmatprep.subr.bf16.mxu0 %v4938_v24  ;;  %566 = vmatmul.mubr.f32.vlgmr.msra.gmra.mrb[0].mxu1 %v5610_v0 }
  0x85   : > { %3541 = vmatpush1.bf16.msra.mxu1 %v4946_v35  ;;  %711 = vmatprep.mubr.f32.mxu1 %v5610_v0 }
  0x86   : > { %3543 = vmatprep.subr.bf16.mxu1 %v4957_v41  ;;  %2816 = vperm.xlu0 %4201, %v2814_v54  }
  0x87   : > { %3537 = vmatpush1.bf16.msra.mxu0 %v4950_v40 }
  0x88   : > { %3547 = vmatprep.subr.bf16.mxu0 %v4722_v5 }
  0x89   : > { %3545 = vmatpush1.bf16.msra.mxu1 %v4967_v51 }
  0x8a   : > { %3409 = vmatmul.mubr.msk.f32.vlgmr.msra.gmra.mrb[0].mxu0 %vm572_vm4, %v425_v55  ;;  %3579 = vmatprep.subr.bf16.mxu1 %v4741_v18 }
  0x8b   : > { %3549 = vmatpush1.bf16.msra.mxu0 %v4727_v9  ;;  %857 = vmatprep.mubr.f32.mxu0 %v5610_v0 }
  0x8c   : > { %3551 = vmatprep.subr.bf16.mxu0 %v4729_v10  ;;  %3410 = vmatmul.mubr.msk.f32.vlgmr.msra.gmra.mrb[0].mxu1 %vm572_vm4, %v425_v55 }
  0x8d   : > { %779 = vperm.xlu0 %4201, %v4892_v46   ;;  %3581 = vmatpush1.bf16.msra.mxu1 %v4749_v23  ;;  %v1450_v46 = vsel %vm1449_vm5, 1, %v4500_v1 }
  0x8e   : > { %928 = vmatprep.mubr.f32.mxu1 %v5610_v0  ;;  %3583 = vmatprep.subr.bf16.mxu1 %v4755_v27 }
  0x8f   : > { %3553 = vmatpush1.bf16.msra.mxu0 %v4739_v17  ;;  %1452 = vperm.xlu1 %4202, %v1450_v46   ;;  %v5060_v46 = vrot.slane %v418_v20, %v733_v30 }
  0x90   : > { %3555 = vmatprep.subr.bf16.mxu0 %v4747_v22 }
  0x91   : > { %1461 = vperm.xlu0 %4201, %v1131_v57   ;;  %3585 = vmatpush1.bf16.msra.mxu1 %v4766_v33 }
  0x92   : > { %3587 = vmatprep.subr.bf16.mxu1 %v4775_v39 }
  0x93   : > { %3557 = vmatpush1.bf16.msra.mxu0 %v4763_v32  ;;  %1793 = vperm.xlu1 %4202, %v1791_v62  }
  0x94   : > { %3559 = vmatprep.subr.bf16.mxu0 %v4772_v37 }
  0x95   : > { %2143 = vperm.xlu0 %4201, %v4915_v63   ;;  %3589 = vmatpush1.bf16.msra.mxu1 %v4783_v45  ;;  %v2154_v63 = vld [vmem:[%s2153_s12] sm:$0xff]  ;;  %s787_s12 = scalar_lea.vmem %s5600_s0, %s4847_s15  ;;  %s2147_s15 = scalar_lea.vmem %s5076_s2, %s4858_s20 [#allocation9] }
  0x96   : > { %3591 = vmatprep.subr.bf16.mxu1 %v4791_v49  ;;  %vm2472_vm7 = vcmp.gt.f32.partialorder %v2154_v63, 0.0  ;;  %s3170_s20 = scalar_lea.vmem %s5076_s2, %s5041_s14 [#allocation9] }
  0x97   : > { %3561 = vmatpush1.bf16.msra.mxu0 %v4787_v47  ;;  %v2473_v3 = vsel %vm2472_vm7, 1, %v4500_v1  ;;  %v5056_v1 = vrot.slane %v418_v20, %v725_v21 }
  0x98   : > { %3563 = vmatprep.subr.bf16.mxu0 %v4796_v52  ;;  %2475 = vperm.xlu1 %4202, %v2473_v3  }
  0x99   : > { %2825 = vperm.xlu0 %4201, %v2495_v34   ;;  %3593 = vmatpush1.bf16.msra.mxu1 %v4804_v58 }
  0x9a   : > { %3595 = vmatprep.subr.bf16.mxu1 %v4811_v61 }
  0x9b   : > { %3565 = vmatpush1.bf16.msra.mxu0 %v4807_v59 }
  0x9c   : > { %3567 = vmatprep.subr.bf16.mxu0 %v4816_v2  ;;  %3157 = vperm.xlu1 %4202, %v3155_v6  }
  0x9d   : > { %3597 = vmatpush1.bf16.msra.mxu1 %v4828_v11 }
  0x9e   : > { %3599 = vmatprep.subr.bf16.mxu1 %v4837_v14 }
  0x9f   : > { %3569 = vmatpush1.bf16.msra.mxu0 %v4833_v12 }
  0xa0   : > { %3571 = vmatprep.subr.bf16.mxu0 %v4842_v19  ;;  %1120 = vperm.xlu1 %4202, %v4894_v48  }
  0xa1   : > { %3601 = vmatpush1.bf16.msra.mxu1 %v4854_v28 }
  0xa2   : > { %3603 = vmatprep.subr.bf16.mxu1 %v4865_v31 }
  0xa3   : > { %3573 = vmatpush1.bf16.msra.mxu0 %v4861_v29 }
  0xa4   : > { %3575 = vmatprep.subr.bf16.mxu0 %v4878_v36  ;;  %1802 = vperm.xlu1 %4202, %v1472_v60   ;;  %v729_v60 = vsub.s32 2, %v720_v13 }
  0xa5   : > { %3605 = vmatpush1.bf16.msra.mxu1 %v4890_v44 }
  0xa6   : > { %3607 = vmatprep.subr.bf16.mxu1 %v4903_v53 }
  0xa7   : > { %3577 = vmatpush1.bf16.msra.mxu0 %v4899_v50 }
  0xa8   : > { %3611 = vmatprep.subr.bf16.mxu0 %v4910_v56  ;;  %2484 = vperm.xlu1 %4202, %v2154_v63   ;;  %v5063_v63 = vrot.slane %v418_v20, %v729_v60 }
  0xa9   : > { %3609 = vmatpush1.bf16.msra.mxu1 %v4925_v7 }
  0xaa   : > { %3619 = vmatprep.subr.bf16.mxu1 %v4940_v25 }
  0xac   : > { %3166 = vperm.xlu1 %4202, %v2836_v4  }
 0x15d   : > { %v642_v48 = vpop.f32.mrb[0].mxu0 }
 0x15e   : > { %v739_v34 = vadd.f32 %v5054_v26, %v642_v48  ;;  %v644_v38 = vpop.f32.mrb[1].mxu0  ;;  %v771_v48 = vpop.permute.xlu0 %770 }
 0x15f   : > { %v740_v42 = vadd.f32 %v5056_v1, %v644_v38  ;;  %v713_v54 = vpop.f32.mrb[0].mxu1  ;;  %vm772_vm9 = vcmp.eq.s32.totalorder %v771_v48, 1  ;;  %v788_v48 = vld [vmem:[%s787_s12] sm:$0xff]  ;;  %s1806_s12 = scalar_lea.vmem %s5076_s2, %s5025_s17 [#allocation9]  ;;  %s3180_s17 = scalar_lea.sflag [#allocation11], %s4697_s18 }
 0x160   : > { %v3411_v43 = vmul.f32 -1.442695, %v739_v34  ;;  %v715_v57 = vpop.f32.mrb[1].mxu1  ;;  %v741_v4 = vadd.f32 %v5063_v63, %v713_v54 }
 0x161   : > { %v3412_v55 = vmul.f32 -1.442695, %v740_v42  ;;  %v742_v62 = vadd.f32 %v5060_v46, %v715_v57 }
 0x162   : > { %4203 = vpow2.f32 %v3411_v43  ;;  %v5066_v43 = vpop.permute.xlu0 %1111 }
 0x163   : > { %4205 = vpow2.f32 %v3412_v55  ;;  %v3413_v3 = vmul.f32 -1.442695, %v742_v62  ;;  %vm1113_vm10 = vcmp.eq.s32.totalorder %v5066_v43, 1 }
 0x165   : > { %4207 = vpow2.f32 %v3413_v3 }
 0x166   : > { %4209 = vtanh.f32 %v741_v4  ;;  %v5071_v60 = vpop.permute.xlu0 %2134 }
 0x167   : > { %5629 = vst [vmem:[#allocation16_spill] sm:$0xff] %v5071_v60 }
 0x16a   : > { %v5074_v62 = vpop.permute.xlu0 %2816 }
 0x16b   : > { %5630 = vst [vmem:[#allocation17_spill] sm:$0xff] %v5074_v62 }
 0x16c   : > { %v4204_v6 = vpop.eup %4203 }
 0x16d   : > { %v4206_v8 = vpop.eup %4205  ;;  %v746_v16 = vadd.f32 1.0, %v4204_v6 }
 0x16e   : > { %v752_v21 = vadd.f32 1.0, %v4206_v8  ;;  %v780_v8 = vpop.permute.xlu0 %779 }
 0x16f   : > { %4211 = vrcp.f32 %v746_v16  ;;  %v4208_v30 = vpop.eup %4207 }
 0x170   : > { %4213 = vrcp.f32 %v752_v21  ;;  %v4210_v13 = vpop.eup %4209  ;;  %v759_v42 = vadd.f32 1.0, %v4208_v30 }
 0x172   : > { %4215 = vrcp.f32 %v759_v42 }
 0x179   : > { %v4212_v34 = vpop.eup %4211 }
 0x17a   : > { %v4214_v38 = vpop.eup %4213  ;;  %v763_v20 = vmul.f32 %v4212_v34, %v4210_v13 }
 0x17b   : > { %v762_v54 = vmul.f32 0.0, %v4214_v38 }
 0x17c   : > { %v4216_v3 = vpop.eup %4215 }
 0x17d   : > { %v764_v55 = vadd.f32 %v763_v20, %v762_v54 }
 0x17f   : > { %4217 = vtanh.f32 %v764_v55  ;;  %v5069_v57 = vsel %vm772_vm9, %v764_v55, 0.0 }
 0x189   : > { %v4218_v4 = vpop.eup %4217 }
 0x18a   : > { %v766_v6 = vmul.f32 %v4218_v4, %v4216_v3 }
 0x18c   : > { %v5081_v16 = vsel %vm772_vm9, %v766_v6, 0.0  ;;  %3464 = vmatmul.mubr.msk.f32.vlgmr.msra.gmra.mrb[2].mxu0 %vm772_vm9, %v766_v6  ;;  %3465 = vmatmul.mubr.msk.f32.vlgmr.msra.gmra.mrb[2].mxu1 %vm772_vm9, %v766_v6 }
 0x18d   : > { %v782_v21 = vmul.f32 %v780_v8, %v5081_v16  ;;  %3613 = vmatpush1.bf16.msra.mxu0 %v4930_v15  ;;  %3621 = vmatpush1.bf16.msra.mxu1 %v4946_v35 }
 0x18e   : > { %3615 = vmatprep.subr.bf16.mxu0 %v4938_v24  ;;  %3623 = vmatprep.subr.bf16.mxu1 %v4957_v41 }
 0x18f   : > { %784 = vst [vmem:[%s783_s8] sm:$0xff] %v782_v21  ;;  %1002 = vmatprep.mubr.f32.mxu0 %v5610_v0  ;;  %1073 = vmatprep.mubr.f32.mxu1 %v5610_v0  ;;  %s1465_s8 = scalar_lea.vmem %s5076_s2, %s4973_s19 [#allocation9]  ;;  %s2488_s19 = scalar_lea.vmem %s5076_s2, %s5031_s11 [#allocation9] }
 0x191   : > { %3617 = vmatpush1.bf16.msra.mxu0 %v4950_v40  ;;  %3625 = vmatpush1.bf16.msra.mxu1 %v4967_v51 }
 0x192   : > { %3627 = vmatprep.subr.bf16.mxu0 %v4722_v5  ;;  %3659 = vmatprep.subr.bf16.mxu1 %v4741_v18 }
 0x194   : > { %3415 = vmatmul.mubr.msk.f32.vlgmr.msra.gmra.mrb[2].mxu0 %vm572_vm4, %v788_v48  ;;  %3416 = vmatmul.mubr.msk.f32.vlgmr.msra.gmra.mrb[2].mxu1 %vm572_vm4, %v788_v48 }
 0x195   : > { %3629 = vmatpush1.bf16.msra.mxu0 %v4727_v9  ;;  %3661 = vmatpush1.bf16.msra.mxu1 %v4749_v23 }
 0x196   : > { %3631 = vmatprep.subr.bf16.mxu0 %v4729_v10  ;;  %3663 = vmatprep.subr.bf16.mxu1 %v4755_v27 }
 0x197   : > { %1198 = vmatprep.mubr.f32.mxu0 %v5610_v0  ;;  %1269 = vmatprep.mubr.f32.mxu1 %v5610_v0 }
 0x199   : > { %3633 = vmatpush1.bf16.msra.mxu0 %v4739_v17  ;;  %3665 = vmatpush1.bf16.msra.mxu1 %v4766_v33 }
 0x19a   : > { %3635 = vmatprep.subr.bf16.mxu0 %v4747_v22  ;;  %3667 = vmatprep.subr.bf16.mxu1 %v4775_v39 }
 0x19d   : > { %3637 = vmatpush1.bf16.msra.mxu0 %v4763_v32  ;;  %3669 = vmatpush1.bf16.msra.mxu1 %v4783_v45 }
 0x19e   : > { %3639 = vmatprep.subr.bf16.mxu0 %v4772_v37  ;;  %3671 = vmatprep.subr.bf16.mxu1 %v4791_v49 }
 0x1a1   : > { %3641 = vmatpush1.bf16.msra.mxu0 %v4787_v47  ;;  %3673 = vmatpush1.bf16.msra.mxu1 %v4804_v58 }
 0x1a2   : > { %3643 = vmatprep.subr.bf16.mxu0 %v4796_v52  ;;  %3675 = vmatprep.subr.bf16.mxu1 %v4811_v61 }
 0x1a5   : > { %3645 = vmatpush1.bf16.msra.mxu0 %v4807_v59  ;;  %3677 = vmatpush1.bf16.msra.mxu1 %v4828_v11 }
 0x1a6   : > { %3647 = vmatprep.subr.bf16.mxu0 %v4816_v2  ;;  %3679 = vmatprep.subr.bf16.mxu1 %v4837_v14 }
 0x1a9   : > { %3649 = vmatpush1.bf16.msra.mxu0 %v4833_v12  ;;  %3681 = vmatpush1.bf16.msra.mxu1 %v4854_v28 }
 0x1aa   : > { %3651 = vmatprep.subr.bf16.mxu0 %v4842_v19  ;;  %3683 = vmatprep.subr.bf16.mxu1 %v4865_v31 }
 0x1ad   : > { %3653 = vmatpush1.bf16.msra.mxu0 %v4861_v29  ;;  %3685 = vmatpush1.bf16.msra.mxu1 %v4890_v44 }
 0x1ae   : > { %3655 = vmatprep.subr.bf16.mxu0 %v4878_v36  ;;  %3687 = vmatprep.subr.bf16.mxu1 %v4903_v53 }
 0x1b1   : > { %3657 = vmatpush1.bf16.msra.mxu0 %v4899_v50  ;;  %3689 = vmatpush1.bf16.msra.mxu1 %v4925_v7 }
 0x1b2   : > { %3691 = vmatprep.subr.bf16.mxu0 %v4910_v56  ;;  %3699 = vmatprep.subr.bf16.mxu1 %v4940_v25 }
 0x267   : > { %v1004_v30 = vpop.f32.mrb[2].mxu0  ;;  %v1075_v13 = vpop.f32.mrb[2].mxu1 }
 0x268   : > { %v1080_v34 = vadd.f32 %v1004_v30, %v5054_v26  ;;  %v1006_v38 = vpop.f32.mrb[3].mxu0  ;;  %v1077_v42 = vpop.f32.mrb[3].mxu1  ;;  %v1082_v6 = vadd.f32 %v1075_v13, %v5063_v63 }
 0x269   : > { %v1081_v20 = vadd.f32 %v1006_v38, %v5056_v1  ;;  %v1083_v3 = vadd.f32 %v1077_v42, %v5060_v46  ;;  %v5140_v30 = vpop.permute.xlu1 %1452 }
 0x26a   : > { %v3417_v54 = vmul.f32 -1.442695, %v1080_v34  ;;  %vm1454_vm11 = vcmp.eq.s32.totalorder %v5140_v30, 1  ;;  %v1470_v30 = vld [vmem:[%s1469_s28] sm:$0xff]  ;;  %s2492_s28 = scalar_lea.vmem %s5600_s0, %s4896_s7 }
 0x26b   : > { %v3418_v55 = vmul.f32 -1.442695, %v1081_v20  ;;  %v3419_v4 = vmul.f32 -1.442695, %v1083_v3 }
 0x26c   : > { %4219 = vpow2.f32 %v3417_v54 }
 0x26d   : > { %4221 = vpow2.f32 %v3418_v55  ;;  %v5142_v20 = vpop.permute.xlu1 %1793 }
 0x26e   : > { %4223 = vpow2.f32 %v3419_v4  ;;  %vm1795_vm12 = vcmp.eq.s32.totalorder %v5142_v20, 1  ;;  %v1811_v20 = vld [vmem:[%s1810_s16] sm:$0xff]  ;;  %s3406_s16 = sshll.u32 %s4697_s18, 3 }
 0x26f   : > { %4225 = vtanh.f32 %v1082_v6 }
 0x271   : > { %v5146_v4 = vpop.permute.xlu1 %2475 }
 0x272   : > { %5631 = vst [vmem:[#allocation18_spill] sm:$0xff] %v5146_v4 }
 0x275   : > { %v5151_v6 = vpop.permute.xlu1 %3157 }
 0x276   : > { %v4220_v8 = vpop.eup %4219  ;;  %5632 = vst [vmem:[#allocation19_spill] sm:$0xff] %v5151_v6 }
 0x277   : > { %v4222_v21 = vpop.eup %4221  ;;  %v1087_v48 = vadd.f32 1.0, %v4220_v8 }
 0x278   : > { %v1093_v0 = vadd.f32 1.0, %v4222_v21  ;;  %v4224_v38 = vpop.eup %4223 }
 0x279   : > { %4227 = vrcp.f32 %v1087_v48  ;;  %v4226_v34 = vpop.eup %4225  ;;  %v1100_v13 = vadd.f32 1.0, %v4224_v38  ;;  %v1121_v62 = vpop.permute.xlu1 %1120 }
 0x27a   : > { %4229 = vrcp.f32 %v1093_v0 }
 0x27b   : > { %4231 = vrcp.f32 %v1100_v13 }
 0x283   : > { %v4228_v54 = vpop.eup %4227 }
 0x284   : > { %v4230_v42 = vpop.eup %4229  ;;  %v1104_v55 = vmul.f32 %v4228_v54, %v4226_v34 }
 0x285   : > { %v1103_v3 = vmul.f32 %v4230_v42, %v5069_v57  ;;  %v4232_v21 = vpop.eup %4231 }
 0x287   : > { %v1105_v8 = vadd.f32 %v1104_v55, %v1103_v3 }
 0x289   : > { %4233 = vtanh.f32 %v1105_v8  ;;  %v5149_v0 = vsel %vm1113_vm10, %v1105_v8, %v5069_v57  ;;  %v5633_v57 = vmov 0.0  }
 0x293   : > { %v4234_v48 = vpop.eup %4233 }
 0x294   : > { %v1107_v34 = vmul.f32 %v4234_v48, %v4232_v21 }
 0x296   : > { %v5156_v38 = vsel %vm1113_vm10, %v1107_v34, %v5081_v16 }
 0x297   : > { %v1123_v43 = vmul.f32 %v1121_v62, %v5156_v38  ;;  %1199 = vmatmul.mubr.f32.vlgmr.msra.gmra.mrb[4].mxu0 %v5156_v38  ;;  %1270 = vmatmul.mubr.f32.vlgmr.msra.gmra.mrb[4].mxu1 %v5156_v38  ;;  %v1129_v62 = vld [vmem:[%s1128_s13] sm:$0xff]  ;;  %s333_s13 = scalar_lea.vmem [#allocation10], %s3406_s16  ;;  %s4501_s16 = smov [#allocation10]  }
 0x298   : > { %3693 = vmatpush1.bf16.msra.mxu0 %v4930_v15  ;;  %3701 = vmatpush1.bf16.msra.mxu1 %v4946_v35 }
 0x299   : > { %1125 = vst [vmem:[%s1124_s26] sm:$0xff] %v1123_v43  ;;  %3695 = vmatprep.subr.bf16.mxu0 %v4938_v24  ;;  %3703 = vmatprep.subr.bf16.mxu1 %v4957_v41  ;;  %s2833_s26 = scalar_lea.vmem %s5600_s0, %s5041_s14 }
 0x29a   : > { %1343 = vmatprep.mubr.f32.mxu0 %v5633_v57  ;;  %1414 = vmatprep.mubr.f32.mxu1 %v5633_v57 }
 0x29c   : > { %3697 = vmatpush1.bf16.msra.mxu0 %v4950_v40  ;;  %3705 = vmatpush1.bf16.msra.mxu1 %v4967_v51 }
 0x29d   : > { %3707 = vmatprep.subr.bf16.mxu0 %v4722_v5  ;;  %3739 = vmatprep.subr.bf16.mxu1 %v4741_v18 }
 0x29f   : > { %3421 = vmatmul.mubr.msk.f32.vlgmr.msra.gmra.mrb[4].mxu0 %vm572_vm4, %v1129_v62  ;;  %3422 = vmatmul.mubr.msk.f32.vlgmr.msra.gmra.mrb[4].mxu1 %vm572_vm4, %v1129_v62 }
 0x2a0   : > { %3709 = vmatpush1.bf16.msra.mxu0 %v4727_v9  ;;  %3741 = vmatpush1.bf16.msra.mxu1 %v4749_v23 }
 0x2a1   : > { %3711 = vmatprep.subr.bf16.mxu0 %v4729_v10  ;;  %3743 = vmatprep.subr.bf16.mxu1 %v4755_v27 }
 0x2a2   : > { %1539 = vmatprep.mubr.f32.mxu0 %v5633_v57  ;;  %1610 = vmatprep.mubr.f32.mxu1 %v5633_v57 }
 0x2a4   : > { %3713 = vmatpush1.bf16.msra.mxu0 %v4739_v17  ;;  %3745 = vmatpush1.bf16.msra.mxu1 %v4766_v33 }
 0x2a5   : > { %3715 = vmatprep.subr.bf16.mxu0 %v4747_v22  ;;  %3747 = vmatprep.subr.bf16.mxu1 %v4775_v39 }
 0x2a8   : > { %3717 = vmatpush1.bf16.msra.mxu0 %v4763_v32  ;;  %3749 = vmatpush1.bf16.msra.mxu1 %v4783_v45 }
 0x2a9   : > { %3719 = vmatprep.subr.bf16.mxu0 %v4772_v37  ;;  %3751 = vmatprep.subr.bf16.mxu1 %v4791_v49 }
 0x2ac   : > { %3721 = vmatpush1.bf16.msra.mxu0 %v4787_v47  ;;  %3753 = vmatpush1.bf16.msra.mxu1 %v4804_v58 }
 0x2ad   : > { %3723 = vmatprep.subr.bf16.mxu0 %v4796_v52  ;;  %3755 = vmatprep.subr.bf16.mxu1 %v4811_v61 }
 0x2b0   : > { %3725 = vmatpush1.bf16.msra.mxu0 %v4807_v59  ;;  %3757 = vmatpush1.bf16.msra.mxu1 %v4828_v11 }
 0x2b1   : > { %3727 = vmatprep.subr.bf16.mxu0 %v4816_v2  ;;  %3759 = vmatprep.subr.bf16.mxu1 %v4837_v14 }
 0x2b4   : > { %3729 = vmatpush1.bf16.msra.mxu0 %v4833_v12  ;;  %3761 = vmatpush1.bf16.msra.mxu1 %v4854_v28 }
 0x2b5   : > { %3731 = vmatprep.subr.bf16.mxu0 %v4842_v19  ;;  %3763 = vmatprep.subr.bf16.mxu1 %v4865_v31 }
 0x2b8   : > { %3733 = vmatpush1.bf16.msra.mxu0 %v4861_v29  ;;  %3765 = vmatpush1.bf16.msra.mxu1 %v4890_v44 }
 0x2b9   : > { %3735 = vmatprep.subr.bf16.mxu0 %v4878_v36  ;;  %3767 = vmatprep.subr.bf16.mxu1 %v4903_v53 }
 0x2bc   : > { %3737 = vmatpush1.bf16.msra.mxu0 %v4899_v50  ;;  %3769 = vmatpush1.bf16.msra.mxu1 %v4925_v7 }
 0x2bd   : > { %3771 = vmatprep.subr.bf16.mxu0 %v4910_v56  ;;  %3779 = vmatprep.subr.bf16.mxu1 %v4940_v25 }
 0x372   : > { %v1345_v16 = vpop.f32.mrb[4].mxu0  ;;  %v1416_v54 = vpop.f32.mrb[4].mxu1 }
 0x373   : > { %v1421_v42 = vadd.f32 %v1345_v16, %v5054_v26  ;;  %v1347_v55 = vpop.f32.mrb[5].mxu0  ;;  %v1418_v13 = vpop.f32.mrb[5].mxu1  ;;  %v1423_v43 = vadd.f32 %v1416_v54, %v5063_v63 }
 0x374   : > { %v1422_v3 = vadd.f32 %v1347_v55, %v5056_v1  ;;  %v1424_v48 = vadd.f32 %v1418_v13, %v5060_v46 }
 0x375   : > { %v3423_v8 = vmul.f32 -1.442695, %v1421_v42 }
 0x376   : > { %v3424_v21 = vmul.f32 -1.442695, %v1422_v3  ;;  %v3425_v34 = vmul.f32 -1.442695, %v1424_v48 }
 0x377   : > { %4235 = vpow2.f32 %v3423_v8 }
 0x378   : > { %4237 = vpow2.f32 %v3424_v21 }
 0x379   : > { %4239 = vpow2.f32 %v3425_v34  ;;  %v1462_v34 = vpop.permute.xlu0 %1461 }
 0x37a   : > { %4241 = vtanh.f32 %v1423_v43 }
 0x381   : > { %v4236_v62 = vpop.eup %4235 }
 0x382   : > { %v4238_v6 = vpop.eup %4237  ;;  %v1428_v4 = vadd.f32 1.0, %v4236_v62 }
 0x383   : > { %v1434_v60 = vadd.f32 1.0, %v4238_v6  ;;  %v4240_v16 = vpop.eup %4239 }
 0x384   : > { %4243 = vrcp.f32 %v1428_v4  ;;  %v4242_v42 = vpop.eup %4241  ;;  %v1441_v21 = vadd.f32 1.0, %v4240_v16 }
 0x385   : > { %4245 = vrcp.f32 %v1434_v60 }
 0x386   : > { %4247 = vrcp.f32 %v1441_v21 }
 0x38e   : > { %v4244_v55 = vpop.eup %4243 }
 0x38f   : > { %v4246_v3 = vpop.eup %4245  ;;  %v1445_v8 = vmul.f32 %v4244_v55, %v4242_v42 }
 0x390   : > { %v1444_v13 = vmul.f32 %v4246_v3, %v5149_v0  ;;  %v4248_v60 = vpop.eup %4247 }
 0x392   : > { %v1446_v54 = vadd.f32 %v1445_v8, %v1444_v13 }
 0x394   : > { %4249 = vtanh.f32 %v1446_v54  ;;  %v5218_v6 = vsel %vm1454_vm11, %v1446_v54, %v5149_v0 }
 0x39e   : > { %v4250_v4 = vpop.eup %4249 }
 0x39f   : > { %v1448_v48 = vmul.f32 %v4250_v4, %v4248_v60 }
 0x3a1   : > { %v5223_v43 = vsel %vm1454_vm11, %v1448_v48, %v5156_v38 }
 0x3a2   : > { %v1464_v62 = vmul.f32 %v1462_v34, %v5223_v43  ;;  %1540 = vmatmul.mubr.f32.vlgmr.msra.gmra.mrb[6].mxu0 %v5223_v43  ;;  %1611 = vmatmul.mubr.f32.vlgmr.msra.gmra.mrb[6].mxu1 %v5223_v43 }
 0x3a3   : > { %3773 = vmatpush1.bf16.msra.mxu0 %v4930_v15  ;;  %3781 = vmatpush1.bf16.msra.mxu1 %v4946_v35 }
 0x3a4   : > { %1466 = vst [vmem:[%s1465_s8] sm:$0xff] %v1464_v62  ;;  %3775 = vmatprep.subr.bf16.mxu0 %v4938_v24  ;;  %3783 = vmatprep.subr.bf16.mxu1 %v4957_v41  ;;  %s2151_s8 = scalar_lea.vmem %s5600_s0, %s5031_s11 }
 0x3a5   : > { %1684 = vmatprep.mubr.f32.mxu0 %v5633_v57  ;;  %1755 = vmatprep.mubr.f32.mxu1 %v5633_v57 }
 0x3a7   : > { %3777 = vmatpush1.bf16.msra.mxu0 %v4950_v40  ;;  %3785 = vmatpush1.bf16.msra.mxu1 %v4967_v51 }
 0x3a8   : > { %3787 = vmatprep.subr.bf16.mxu0 %v4722_v5  ;;  %3819 = vmatprep.subr.bf16.mxu1 %v4741_v18 }
 0x3aa   : > { %3427 = vmatmul.mubr.msk.f32.vlgmr.msra.gmra.mrb[6].mxu0 %vm572_vm4, %v1470_v30  ;;  %3428 = vmatmul.mubr.msk.f32.vlgmr.msra.gmra.mrb[6].mxu1 %vm572_vm4, %v1470_v30 }
 0x3ab   : > { %3789 = vmatpush1.bf16.msra.mxu0 %v4727_v9  ;;  %3821 = vmatpush1.bf16.msra.mxu1 %v4749_v23 }
 0x3ac   : > { %3791 = vmatprep.subr.bf16.mxu0 %v4729_v10  ;;  %3823 = vmatprep.subr.bf16.mxu1 %v4755_v27 }
 0x3ad   : > { %1880 = vmatprep.mubr.f32.mxu0 %v5633_v57  ;;  %1951 = vmatprep.mubr.f32.mxu1 %v5633_v57 }
 0x3af   : > { %3793 = vmatpush1.bf16.msra.mxu0 %v4739_v17  ;;  %3825 = vmatpush1.bf16.msra.mxu1 %v4766_v33 }
 0x3b0   : > { %3795 = vmatprep.subr.bf16.mxu0 %v4747_v22  ;;  %3827 = vmatprep.subr.bf16.mxu1 %v4775_v39 }
 0x3b3   : > { %3797 = vmatpush1.bf16.msra.mxu0 %v4763_v32  ;;  %3829 = vmatpush1.bf16.msra.mxu1 %v4783_v45 }
 0x3b4   : > { %3799 = vmatprep.subr.bf16.mxu0 %v4772_v37  ;;  %3831 = vmatprep.subr.bf16.mxu1 %v4791_v49 }
 0x3b7   : > { %3801 = vmatpush1.bf16.msra.mxu0 %v4787_v47  ;;  %3833 = vmatpush1.bf16.msra.mxu1 %v4804_v58 }
 0x3b8   : > { %3803 = vmatprep.subr.bf16.mxu0 %v4796_v52  ;;  %3835 = vmatprep.subr.bf16.mxu1 %v4811_v61 }
 0x3bb   : > { %3805 = vmatpush1.bf16.msra.mxu0 %v4807_v59  ;;  %3837 = vmatpush1.bf16.msra.mxu1 %v4828_v11 }
 0x3bc   : > { %3807 = vmatprep.subr.bf16.mxu0 %v4816_v2  ;;  %3839 = vmatprep.subr.bf16.mxu1 %v4837_v14 }
 0x3bf   : > { %3809 = vmatpush1.bf16.msra.mxu0 %v4833_v12  ;;  %3841 = vmatpush1.bf16.msra.mxu1 %v4854_v28 }
 0x3c0   : > { %3811 = vmatprep.subr.bf16.mxu0 %v4842_v19  ;;  %3843 = vmatprep.subr.bf16.mxu1 %v4865_v31 }
 0x3c3   : > { %3813 = vmatpush1.bf16.msra.mxu0 %v4861_v29  ;;  %3845 = vmatpush1.bf16.msra.mxu1 %v4890_v44 }
 0x3c4   : > { %3815 = vmatprep.subr.bf16.mxu0 %v4878_v36  ;;  %3847 = vmatprep.subr.bf16.mxu1 %v4903_v53 }
 0x3c7   : > { %3817 = vmatpush1.bf16.msra.mxu0 %v4899_v50  ;;  %3849 = vmatpush1.bf16.msra.mxu1 %v4925_v7 }
 0x3c8   : > { %3851 = vmatprep.subr.bf16.mxu0 %v4910_v56  ;;  %3859 = vmatprep.subr.bf16.mxu1 %v4940_v25 }
 0x47d   : > { %v1686_v0 = vpop.f32.mrb[6].mxu0  ;;  %v1757_v38 = vpop.f32.mrb[6].mxu1 }
 0x47e   : > { %v1762_v16 = vadd.f32 %v1686_v0, %v5054_v26  ;;  %v1688_v42 = vpop.f32.mrb[7].mxu0  ;;  %v1759_v55 = vpop.f32.mrb[7].mxu1  ;;  %v1764_v60 = vadd.f32 %v1757_v38, %v5063_v63 }
 0x47f   : > { %v1763_v3 = vadd.f32 %v1688_v42, %v5056_v1  ;;  %v1765_v13 = vadd.f32 %v1759_v55, %v5060_v46 }
 0x480   : > { %v3429_v8 = vmul.f32 -1.442695, %v1762_v16 }
 0x481   : > { %v3430_v21 = vmul.f32 -1.442695, %v1763_v3  ;;  %v3431_v54 = vmul.f32 -1.442695, %v1765_v13 }
 0x482   : > { %4251 = vpow2.f32 %v3429_v8 }
 0x483   : > { %4253 = vpow2.f32 %v3430_v21 }
 0x484   : > { %4255 = vpow2.f32 %v3431_v54 }
 0x485   : > { %4257 = vtanh.f32 %v1764_v60 }
 0x48c   : > { %v4252_v4 = vpop.eup %4251 }
 0x48d   : > { %v4254_v48 = vpop.eup %4253  ;;  %v1769_v34 = vadd.f32 1.0, %v4252_v4  ;;  %v1803_v4 = vpop.permute.xlu1 %1802 }
 0x48e   : > { %v1775_v62 = vadd.f32 1.0, %v4254_v48  ;;  %v4256_v30 = vpop.eup %4255 }
 0x48f   : > { %4259 = vrcp.f32 %v1769_v34  ;;  %v4258_v0 = vpop.eup %4257  ;;  %v1782_v8 = vadd.f32 1.0, %v4256_v30 }
 0x490   : > { %4261 = vrcp.f32 %v1775_v62 }
 0x491   : > { %4263 = vrcp.f32 %v1782_v8 }
 0x499   : > { %v4260_v16 = vpop.eup %4259 }
 0x49a   : > { %v4262_v42 = vpop.eup %4261  ;;  %v1786_v3 = vmul.f32 %v4260_v16, %v4258_v0 }
 0x49b   : > { %v1785_v55 = vmul.f32 %v4262_v42, %v5218_v6  ;;  %v4264_v13 = vpop.eup %4263 }
 0x49d   : > { %v1787_v21 = vadd.f32 %v1786_v3, %v1785_v55 }
 0x49f   : > { %4265 = vtanh.f32 %v1787_v21  ;;  %v5285_v38 = vsel %vm1795_vm12, %v1787_v21, %v5218_v6 }
 0x4a9   : > { %v4266_v54 = vpop.eup %4265 }
 0x4aa   : > { %v1789_v60 = vmul.f32 %v4266_v54, %v4264_v13 }
 0x4ac   : > { %v5290_v48 = vsel %vm1795_vm12, %v1789_v60, %v5223_v43 }
 0x4ad   : > { %v1805_v34 = vmul.f32 %v1803_v4, %v5290_v48  ;;  %1881 = vmatmul.mubr.f32.vlgmr.msra.gmra.mrb[8].mxu0 %v5290_v48  ;;  %1952 = vmatmul.mubr.f32.vlgmr.msra.gmra.mrb[8].mxu1 %v5290_v48 }
 0x4ae   : > { %3853 = vmatpush1.bf16.msra.mxu0 %v4930_v15  ;;  %3861 = vmatpush1.bf16.msra.mxu1 %v4946_v35 }
 0x4af   : > { %1807 = vst [vmem:[%s1806_s12] sm:$0xff] %v1805_v34  ;;  %3855 = vmatprep.subr.bf16.mxu0 %v4938_v24  ;;  %3863 = vmatprep.subr.bf16.mxu1 %v4957_v41  ;;  %s2829_s12 = scalar_lea.vmem %s5076_s2, %s4896_s7 [#allocation9] }
 0x4b0   : > { %2025 = vmatprep.mubr.f32.mxu0 %v5633_v57  ;;  %2096 = vmatprep.mubr.f32.mxu1 %v5633_v57 }
 0x4b2   : > { %3857 = vmatpush1.bf16.msra.mxu0 %v4950_v40  ;;  %3865 = vmatpush1.bf16.msra.mxu1 %v4967_v51 }
 0x4b3   : > { %3867 = vmatprep.subr.bf16.mxu0 %v4722_v5  ;;  %3899 = vmatprep.subr.bf16.mxu1 %v4741_v18 }
 0x4b5   : > { %3433 = vmatmul.mubr.msk.f32.vlgmr.msra.gmra.mrb[8].mxu0 %vm572_vm4, %v1811_v20  ;;  %3434 = vmatmul.mubr.msk.f32.vlgmr.msra.gmra.mrb[8].mxu1 %vm572_vm4, %v1811_v20 }
 0x4b6   : > { %3869 = vmatpush1.bf16.msra.mxu0 %v4727_v9  ;;  %3901 = vmatpush1.bf16.msra.mxu1 %v4749_v23 }
 0x4b7   : > { %3871 = vmatprep.subr.bf16.mxu0 %v4729_v10  ;;  %3903 = vmatprep.subr.bf16.mxu1 %v4755_v27 }
 0x4b8   : > { %2221 = vmatprep.mubr.f32.mxu0 %v5633_v57  ;;  %2292 = vmatprep.mubr.f32.mxu1 %v5633_v57 }
 0x4ba   : > { %3873 = vmatpush1.bf16.msra.mxu0 %v4739_v17  ;;  %3905 = vmatpush1.bf16.msra.mxu1 %v4766_v33 }
 0x4bb   : > { %3875 = vmatprep.subr.bf16.mxu0 %v4747_v22  ;;  %3907 = vmatprep.subr.bf16.mxu1 %v4775_v39 }
 0x4be   : > { %3877 = vmatpush1.bf16.msra.mxu0 %v4763_v32  ;;  %3909 = vmatpush1.bf16.msra.mxu1 %v4783_v45 }
 0x4bf   : > { %3879 = vmatprep.subr.bf16.mxu0 %v4772_v37  ;;  %3911 = vmatprep.subr.bf16.mxu1 %v4791_v49 }
 0x4c2   : > { %3881 = vmatpush1.bf16.msra.mxu0 %v4787_v47  ;;  %3913 = vmatpush1.bf16.msra.mxu1 %v4804_v58 }
 0x4c3   : > { %3883 = vmatprep.subr.bf16.mxu0 %v4796_v52  ;;  %3915 = vmatprep.subr.bf16.mxu1 %v4811_v61 }
 0x4c6   : > { %3885 = vmatpush1.bf16.msra.mxu0 %v4807_v59  ;;  %3917 = vmatpush1.bf16.msra.mxu1 %v4828_v11 }
 0x4c7   : > { %3887 = vmatprep.subr.bf16.mxu0 %v4816_v2  ;;  %3919 = vmatprep.subr.bf16.mxu1 %v4837_v14 }
 0x4ca   : > { %3889 = vmatpush1.bf16.msra.mxu0 %v4833_v12  ;;  %3921 = vmatpush1.bf16.msra.mxu1 %v4854_v28 }
 0x4cb   : > { %3891 = vmatprep.subr.bf16.mxu0 %v4842_v19  ;;  %3923 = vmatprep.subr.bf16.mxu1 %v4865_v31 }
 0x4ce   : > { %3893 = vmatpush1.bf16.msra.mxu0 %v4861_v29  ;;  %3925 = vmatpush1.bf16.msra.mxu1 %v4890_v44 }
 0x4cf   : > { %3895 = vmatprep.subr.bf16.mxu0 %v4878_v36  ;;  %3927 = vmatprep.subr.bf16.mxu1 %v4903_v53 }
 0x4d2   : > { %3897 = vmatpush1.bf16.msra.mxu0 %v4899_v50  ;;  %3929 = vmatpush1.bf16.msra.mxu1 %v4925_v7 }
 0x4d3   : > { %3931 = vmatprep.subr.bf16.mxu0 %v4910_v56  ;;  %3939 = vmatprep.subr.bf16.mxu1 %v4940_v25 }
 0x588   : > { %v2027_v6 = vpop.f32.mrb[8].mxu0  ;;  %v2098_v43 = vpop.f32.mrb[8].mxu1 }
 0x589   : > { %v2103_v62 = vadd.f32 %v2027_v6, %v5054_v26  ;;  %v2029_v30 = vpop.f32.mrb[9].mxu0  ;;  %v2100_v0 = vpop.f32.mrb[9].mxu1  ;;  %v2105_v21 = vadd.f32 %v2098_v43, %v5063_v63  ;;  %v5634_v43 = vld [vmem:[#allocation16_spill] sm:$0xff] }
 0x58a   : > { %v2104_v16 = vadd.f32 %v2029_v30, %v5056_v1  ;;  %v2106_v8 = vadd.f32 %v2100_v0, %v5060_v46  ;;  %vm2136_vm13 = vcmp.eq.s32.totalorder %v5634_v43, 1 }
 0x58b   : > { %v3435_v42 = vmul.f32 -1.442695, %v2103_v62 }
 0x58c   : > { %v3436_v3 = vmul.f32 -1.442695, %v2104_v16  ;;  %v3437_v55 = vmul.f32 -1.442695, %v2106_v8 }
 0x58d   : > { %4267 = vpow2.f32 %v3435_v42 }
 0x58e   : > { %4269 = vpow2.f32 %v3436_v3 }
 0x58f   : > { %4271 = vpow2.f32 %v3437_v55 }
 0x590   : > { %4273 = vtanh.f32 %v2105_v21 }
 0x597   : > { %v4268_v13 = vpop.eup %4267 }
 0x598   : > { %v4270_v54 = vpop.eup %4269  ;;  %v2110_v60 = vadd.f32 1.0, %v4268_v13  ;;  %v2144_v13 = vpop.permute.xlu0 %2143 }
 0x599   : > { %v2116_v4 = vadd.f32 1.0, %v4270_v54  ;;  %v4272_v34 = vpop.eup %4271 }
 0x59a   : > { %4275 = vrcp.f32 %v2110_v60  ;;  %v4274_v20 = vpop.eup %4273  ;;  %v2123_v16 = vadd.f32 1.0, %v4272_v34 }
 0x59b   : > { %4277 = vrcp.f32 %v2116_v4 }
 0x59c   : > { %4279 = vrcp.f32 %v2123_v16 }
 0x5a4   : > { %v4276_v6 = vpop.eup %4275 }
 0x5a5   : > { %v4278_v62 = vpop.eup %4277  ;;  %v2127_v30 = vmul.f32 %v4276_v6, %v4274_v20 }
 0x5a6   : > { %v2126_v0 = vmul.f32 %v4278_v62, %v5285_v38  ;;  %v4280_v8 = vpop.eup %4279 }
 0x5a8   : > { %v2128_v42 = vadd.f32 %v2127_v30, %v2126_v0 }
 0x5aa   : > { %4281 = vtanh.f32 %v2128_v42  ;;  %v5352_v3 = vsel %vm2136_vm13, %v2128_v42, %v5285_v38  ;;  %v2152_v38 = vld [vmem:[%s2151_s8] sm:$0xff]  ;;  %s3208_s8 = sshll.u32 %s333_s13, 4  ;;  %s5528_s8 = int_to_ptr.vmem [resolvable:$true] %s3208_s8 }
 0x5b4   : > { %v4282_v55 = vpop.eup %4281 }
 0x5b5   : > { %v2130_v21 = vmul.f32 %v4282_v55, %v4280_v8 }
 0x5b7   : > { %v5357_v54 = vsel %vm2136_vm13, %v2130_v21, %v5290_v48 }
 0x5b8   : > { %v2146_v60 = vmul.f32 %v2144_v13, %v5357_v54  ;;  %2222 = vmatmul.mubr.f32.vlgmr.msra.gmra.mrb[10].mxu0 %v5357_v54  ;;  %2293 = vmatmul.mubr.f32.vlgmr.msra.gmra.mrb[10].mxu1 %v5357_v54 }
 0x5b9   : > { %3933 = vmatpush1.bf16.msra.mxu0 %v4930_v15  ;;  %3941 = vmatpush1.bf16.msra.mxu1 %v4946_v35 }
 0x5ba   : > { %2148 = vst [vmem:[%s2147_s15] sm:$0xff] %v2146_v60  ;;  %3935 = vmatprep.subr.bf16.mxu0 %v4938_v24  ;;  %3943 = vmatprep.subr.bf16.mxu1 %v4957_v41  ;;  %s3458_s15 = sshll.u32 %s4562_s25, 7 }
 0x5bb   : > { %2366 = vmatprep.mubr.f32.mxu0 %v5633_v57  ;;  %2437 = vmatprep.mubr.f32.mxu1 %v5633_v57  ;;  %s5526_s25 = scalar_lea.hbm %s5606_s6, %s3458_s15 }
 0x5bd   : > { %3937 = vmatpush1.bf16.msra.mxu0 %v4950_v40  ;;  %3945 = vmatpush1.bf16.msra.mxu1 %v4967_v51 }
 0x5be   : > { %3947 = vmatprep.subr.bf16.mxu0 %v4722_v5  ;;  %3979 = vmatprep.subr.bf16.mxu1 %v4741_v18 }
 0x5c0   : > { %3439 = vmatmul.mubr.msk.f32.vlgmr.msra.gmra.mrb[10].mxu0 %vm572_vm4, %v2152_v38  ;;  %3440 = vmatmul.mubr.msk.f32.vlgmr.msra.gmra.mrb[10].mxu1 %vm572_vm4, %v2152_v38 }
 0x5c1   : > { %3949 = vmatpush1.bf16.msra.mxu0 %v4727_v9  ;;  %3981 = vmatpush1.bf16.msra.mxu1 %v4749_v23 }
 0x5c2   : > { %3951 = vmatprep.subr.bf16.mxu0 %v4729_v10  ;;  %3983 = vmatprep.subr.bf16.mxu1 %v4755_v27 }
 0x5c3   : > { %2562 = vmatprep.mubr.f32.mxu0 %v5633_v57  ;;  %2633 = vmatprep.mubr.f32.mxu1 %v5633_v57 }
 0x5c5   : > { %3953 = vmatpush1.bf16.msra.mxu0 %v4739_v17  ;;  %3985 = vmatpush1.bf16.msra.mxu1 %v4766_v33 }
 0x5c6   : > { %3955 = vmatprep.subr.bf16.mxu0 %v4747_v22  ;;  %3987 = vmatprep.subr.bf16.mxu1 %v4775_v39 }
 0x5c9   : > { %3957 = vmatpush1.bf16.msra.mxu0 %v4763_v32  ;;  %3989 = vmatpush1.bf16.msra.mxu1 %v4783_v45 }
 0x5ca   : > { %3959 = vmatprep.subr.bf16.mxu0 %v4772_v37  ;;  %3991 = vmatprep.subr.bf16.mxu1 %v4791_v49 }
 0x5cd   : > { %3961 = vmatpush1.bf16.msra.mxu0 %v4787_v47  ;;  %3993 = vmatpush1.bf16.msra.mxu1 %v4804_v58 }
 0x5ce   : > { %3963 = vmatprep.subr.bf16.mxu0 %v4796_v52  ;;  %3995 = vmatprep.subr.bf16.mxu1 %v4811_v61 }
 0x5d1   : > { %3965 = vmatpush1.bf16.msra.mxu0 %v4807_v59  ;;  %3997 = vmatpush1.bf16.msra.mxu1 %v4828_v11 }
 0x5d2   : > { %3967 = vmatprep.subr.bf16.mxu0 %v4816_v2  ;;  %3999 = vmatprep.subr.bf16.mxu1 %v4837_v14 }
 0x5d5   : > { %3969 = vmatpush1.bf16.msra.mxu0 %v4833_v12  ;;  %4001 = vmatpush1.bf16.msra.mxu1 %v4854_v28 }
 0x5d6   : > { %3971 = vmatprep.subr.bf16.mxu0 %v4842_v19  ;;  %4003 = vmatprep.subr.bf16.mxu1 %v4865_v31 }
 0x5d9   : > { %3973 = vmatpush1.bf16.msra.mxu0 %v4861_v29  ;;  %4005 = vmatpush1.bf16.msra.mxu1 %v4890_v44 }
 0x5da   : > { %3975 = vmatprep.subr.bf16.mxu0 %v4878_v36  ;;  %4007 = vmatprep.subr.bf16.mxu1 %v4903_v53 }
 0x5dd   : > { %3977 = vmatpush1.bf16.msra.mxu0 %v4899_v50  ;;  %4009 = vmatpush1.bf16.msra.mxu1 %v4925_v7 }
 0x5de   : > { %4011 = vmatprep.subr.bf16.mxu0 %v4910_v56  ;;  %4019 = vmatprep.subr.bf16.mxu1 %v4940_v25 }
 0x693   : > { %v2368_v48 = vpop.f32.mrb[10].mxu0  ;;  %v2439_v4 = vpop.f32.mrb[10].mxu1 }
 0x694   : > { %v2444_v34 = vadd.f32 %v2368_v48, %v5054_v26  ;;  %v2370_v20 = vpop.f32.mrb[11].mxu0  ;;  %v2441_v6 = vpop.f32.mrb[11].mxu1  ;;  %v2446_v43 = vadd.f32 %v2439_v4, %v5063_v63  ;;  %v5635_v4 = vld [vmem:[#allocation18_spill] sm:$0xff] }
 0x695   : > { %v2445_v62 = vadd.f32 %v2370_v20, %v5056_v1  ;;  %v2447_v0 = vadd.f32 %v2441_v6, %v5060_v46  ;;  %vm2477_vm14 = vcmp.eq.s32.totalorder %v5635_v4, 1 }
 0x696   : > { %v3441_v30 = vmul.f32 -1.442695, %v2444_v34 }
 0x697   : > { %v3442_v16 = vmul.f32 -1.442695, %v2445_v62  ;;  %v3443_v42 = vmul.f32 -1.442695, %v2447_v0 }
 0x698   : > { %4283 = vpow2.f32 %v3441_v30 }
 0x699   : > { %4285 = vpow2.f32 %v3442_v16 }
 0x69a   : > { %4287 = vpow2.f32 %v3443_v42 }
 0x69b   : > { %4289 = vtanh.f32 %v2446_v43 }
 0x6a2   : > { %v4284_v8 = vpop.eup %4283 }
 0x6a3   : > { %v4286_v55 = vpop.eup %4285  ;;  %v2451_v21 = vadd.f32 1.0, %v4284_v8  ;;  %v2485_v8 = vpop.permute.xlu1 %2484 }
 0x6a4   : > { %v2457_v13 = vadd.f32 1.0, %v4286_v55  ;;  %v4288_v60 = vpop.eup %4287 }
 0x6a5   : > { %4291 = vrcp.f32 %v2451_v21  ;;  %v4290_v38 = vpop.eup %4289  ;;  %v2464_v62 = vadd.f32 1.0, %v4288_v60 }
 0x6a6   : > { %4293 = vrcp.f32 %v2457_v13 }
 0x6a7   : > { %4295 = vrcp.f32 %v2464_v62 }
 0x6af   : > { %v4292_v48 = vpop.eup %4291 }
 0x6b0   : > { %v4294_v34 = vpop.eup %4293  ;;  %v2468_v20 = vmul.f32 %v4292_v48, %v4290_v38 }
 0x6b1   : > { %v2467_v6 = vmul.f32 %v4294_v34, %v5352_v3  ;;  %v4296_v0 = vpop.eup %4295 }
 0x6b3   : > { %v2469_v30 = vadd.f32 %v2468_v20, %v2467_v6 }
 0x6b5   : > { %4297 = vtanh.f32 %v2469_v30  ;;  %v5419_v16 = vsel %vm2477_vm14, %v2469_v30, %v5352_v3  ;;  %v2493_v3 = vld [vmem:[%s2492_s28] sm:$0xff]  ;;  %s5520_s28 = scalar_lea.hbm %s5605_s5, %s3458_s15  ;;  %s4395_s15 = sshll.u32 %s4501_s16, 4  ;;  %s4396_s15 = int_to_ptr.vmem [resolvable:$false] %s4395_s15 }
 0x6b6   : > { %s4397_s11 = scalar_lea.vmem %s4396_s15, 256  ;;  %p4398_p6 = scmp.lt.s32.totalorder %s5528_s8, %s4396_s15 }
 0x6bf   : > { %v4298_v42 = vpop.eup %4297 }
 0x6c0   : > { %v2471_v43 = vmul.f32 %v4298_v42, %v4296_v0  ;;  %v5637_v42 = vld [vmem:[#allocation19_spill] sm:$0xff] }
 0x6c1   : > { %vm3159_vm0 = vcmp.eq.s32.totalorder %v5637_v42, 1 }
 0x6c2   : > { %v5424_v55 = vsel %vm2477_vm14, %v2471_v43, %v5357_v54  ;;  %v3167_v43 = vpop.permute.xlu1 %3166 }
 0x6c3   : > { %v2487_v21 = vmul.f32 %v2485_v8, %v5424_v55  ;;  %2563 = vmatmul.mubr.f32.vlgmr.msra.gmra.mrb[12].mxu0 %v5424_v55  ;;  %2634 = vmatmul.mubr.f32.vlgmr.msra.gmra.mrb[12].mxu1 %v5424_v55 }
 0x6c4   : > { %4013 = vmatpush1.bf16.msra.mxu0 %v4930_v15  ;;  %4021 = vmatpush1.bf16.msra.mxu1 %v4946_v35 }
 0x6c5   : > { %2489 = vst [vmem:[%s2488_s19] sm:$0xff] %v2487_v21  ;;  %4015 = vmatprep.subr.bf16.mxu0 %v4938_v24  ;;  %4023 = vmatprep.subr.bf16.mxu1 %v4957_v41  ;;  %s3192_s19 = sshll.u32 %s5076_s2, 4  ;;  %s5531_s19 = int_to_ptr.vmem [resolvable:$true] %s3192_s19 }
 0x6c6   : > { %2707 = vmatprep.mubr.f32.mxu0 %v5633_v57  ;;  %2778 = vmatprep.mubr.f32.mxu1 %v5633_v57 }
 0x6c8   : > { %4017 = vmatpush1.bf16.msra.mxu0 %v4950_v40  ;;  %4025 = vmatpush1.bf16.msra.mxu1 %v4967_v51 }
 0x6c9   : > { %4027 = vmatprep.subr.bf16.mxu0 %v4722_v5  ;;  %4059 = vmatprep.subr.bf16.mxu1 %v4741_v18 }
 0x6cb   : > { %3445 = vmatmul.mubr.msk.f32.vlgmr.msra.gmra.mrb[12].mxu0 %vm572_vm4, %v2493_v3  ;;  %3446 = vmatmul.mubr.msk.f32.vlgmr.msra.gmra.mrb[12].mxu1 %vm572_vm4, %v2493_v3 }
 0x6cc   : > { %4029 = vmatpush1.bf16.msra.mxu0 %v4727_v9  ;;  %4061 = vmatpush1.bf16.msra.mxu1 %v4749_v23 }
 0x6cd   : > { %4031 = vmatprep.subr.bf16.mxu0 %v4729_v10  ;;  %4063 = vmatprep.subr.bf16.mxu1 %v4755_v27 }
 0x6ce   : > { %2903 = vmatprep.mubr.f32.mxu0 %v5633_v57  ;;  %2974 = vmatprep.mubr.f32.mxu1 %v5633_v57 }
 0x6d0   : > { %4033 = vmatpush1.bf16.msra.mxu0 %v4739_v17  ;;  %4065 = vmatpush1.bf16.msra.mxu1 %v4766_v33 }
 0x6d1   : > { %4035 = vmatprep.subr.bf16.mxu0 %v4747_v22  ;;  %4067 = vmatprep.subr.bf16.mxu1 %v4775_v39 }
 0x6d4   : > { %4037 = vmatpush1.bf16.msra.mxu0 %v4763_v32  ;;  %4069 = vmatpush1.bf16.msra.mxu1 %v4783_v45 }
 0x6d5   : > { %4039 = vmatprep.subr.bf16.mxu0 %v4772_v37  ;;  %4071 = vmatprep.subr.bf16.mxu1 %v4791_v49 }
 0x6d8   : > { %4041 = vmatpush1.bf16.msra.mxu0 %v4787_v47  ;;  %4073 = vmatpush1.bf16.msra.mxu1 %v4804_v58 }
 0x6d9   : > { %4043 = vmatprep.subr.bf16.mxu0 %v4796_v52  ;;  %4075 = vmatprep.subr.bf16.mxu1 %v4811_v61 }
 0x6dc   : > { %4045 = vmatpush1.bf16.msra.mxu0 %v4807_v59  ;;  %4077 = vmatpush1.bf16.msra.mxu1 %v4828_v11 }
 0x6dd   : > { %4047 = vmatprep.subr.bf16.mxu0 %v4816_v2  ;;  %4079 = vmatprep.subr.bf16.mxu1 %v4837_v14 }
 0x6e0   : > { %4049 = vmatpush1.bf16.msra.mxu0 %v4833_v12  ;;  %4081 = vmatpush1.bf16.msra.mxu1 %v4854_v28 }
 0x6e1   : > { %4051 = vmatprep.subr.bf16.mxu0 %v4842_v19  ;;  %4083 = vmatprep.subr.bf16.mxu1 %v4865_v31  ;;  %v5636_v19 = vld [vmem:[#allocation17_spill] sm:$0xff] }
 0x6e2   : > { %vm2818_vm15 = vcmp.eq.s32.totalorder %v5636_v19, 1 }
 0x6e4   : > { %4053 = vmatpush1.bf16.msra.mxu0 %v4861_v29  ;;  %4085 = vmatpush1.bf16.msra.mxu1 %v4890_v44  ;;  %v2826_v44 = vpop.permute.xlu0 %2825 }
 0x6e5   : > { %4055 = vmatprep.subr.bf16.mxu0 %v4878_v36  ;;  %4087 = vmatprep.subr.bf16.mxu1 %v4903_v53 }
 0x6e8   : > { %4057 = vmatpush1.bf16.msra.mxu0 %v4899_v50  ;;  %4089 = vmatpush1.bf16.msra.mxu1 %v4925_v7 }
 0x6e9   : > { %4091 = vmatprep.subr.bf16.mxu0 %v4910_v56  ;;  %4099 = vmatprep.subr.bf16.mxu1 %v4940_v25  ;;  %v2834_v56 = vld [vmem:[%s2833_s26] sm:$0xff]  ;;  %s4391_s26 = scalar_lea.vmem %s5528_s8, 128 }
 0x6ea   : > { %p4392_p3 = scmp.ne.s32.totalorder %s5528_s8, %s4391_s26  ;;  %p4399_p13 = scmp.lt.s32.totalorder %s4397_s11, %s4391_s26 }
 0x6ec   : > { %p4393_p2 = pnand %p4392_p3, %p5638_p0  ;;  %p4400_p1 = por %p4399_p13, %p4398_p6 }
 0x6ee   : > { %p4394_p5 = pneg %p4393_p2 }
 0x6f0   : > { %p4401_p11 = pnand %p4400_p1, %p4394_p5 }
 0x79e   : > { %v2709_v5 = vpop.f32.mrb[12].mxu0  ;;  %v2780_v9 = vpop.f32.mrb[12].mxu1 }
 0x79f   : > { %v2785_v10 = vadd.f32 %v2709_v5, %v5054_v26  ;;  %v2711_v17 = vpop.f32.mrb[13].mxu0  ;;  %v2782_v18 = vpop.f32.mrb[13].mxu1  ;;  %v2787_v37 = vadd.f32 %v2780_v9, %v5063_v63 }
 0x7a0   : > { %v2786_v22 = vadd.f32 %v2711_v17, %v5056_v1  ;;  %v2788_v32 = vadd.f32 %v2782_v18, %v5060_v46 }
 0x7a1   : > { %v3447_v23 = vmul.f32 -1.442695, %v2785_v10 }
 0x7a2   : > { %v3448_v27 = vmul.f32 -1.442695, %v2786_v22  ;;  %v3449_v33 = vmul.f32 -1.442695, %v2788_v32 }
 0x7a3   : > { %4299 = vpow2.f32 %v3447_v23 }
 0x7a4   : > { %4301 = vpow2.f32 %v3448_v27 }
 0x7a5   : > { %4303 = vpow2.f32 %v3449_v33 }
 0x7a6   : > { %4305 = vtanh.f32 %v2787_v37 }
 0x7ad   : > { %v4300_v39 = vpop.eup %4299 }
 0x7ae   : > { %v4302_v45 = vpop.eup %4301  ;;  %v2792_v47 = vadd.f32 1.0, %v4300_v39 }
 0x7af   : > { %v2798_v49 = vadd.f32 1.0, %v4302_v45  ;;  %v4304_v52 = vpop.eup %4303 }
 0x7b0   : > { %4307 = vrcp.f32 %v2792_v47  ;;  %v4306_v58 = vpop.eup %4305  ;;  %v2805_v11 = vadd.f32 1.0, %v4304_v52 }
 0x7b1   : > { %4309 = vrcp.f32 %v2798_v49 }
 0x7b2   : > { %4311 = vrcp.f32 %v2805_v11 }
 0x7ba   : > { %v4308_v59 = vpop.eup %4307 }
 0x7bb   : > { %v4310_v61 = vpop.eup %4309  ;;  %v2809_v2 = vmul.f32 %v4308_v59, %v4306_v58 }
 0x7bc   : > { %v2808_v12 = vmul.f32 %v4310_v61, %v5419_v16  ;;  %v4312_v29 = vpop.eup %4311 }
 0x7be   : > { %v2810_v14 = vadd.f32 %v2809_v2, %v2808_v12 }
 0x7c0   : > { %4313 = vtanh.f32 %v2810_v14  ;;  %v2819_v28 = vsel %vm2818_vm15, %v2810_v14, %v5419_v16 }
 0x7ca   : > { %v4314_v31 = vpop.eup %4313 }
 0x7cb   : > { %v2812_v36 = vmul.f32 %v4314_v31, %v4312_v29 }
 0x7cd   : > { %v5489_v50 = vsel %vm2818_vm15, %v2812_v36, %v5424_v55 }
 0x7ce   : > { %v2828_v53 = vmul.f32 %v2826_v44, %v5489_v50  ;;  %2904 = vmatmul.mubr.f32.vlgmr.msra.gmra.mrb[14].mxu0 %v5489_v50  ;;  %2975 = vmatmul.mubr.f32.vlgmr.msra.gmra.mrb[14].mxu1 %v5489_v50 }
 0x7cf   : > { %4093 = vmatpush1.bf16.msra.mxu0 %v4930_v15  ;;  %4101 = vmatpush1.bf16.msra.mxu1 %v4946_v35 }
 0x7d0   : > { %2830 = vst [vmem:[%s2829_s12] sm:$0xff] %v2828_v53  ;;  %4095 = vmatprep.subr.bf16.mxu0 %v4938_v24  ;;  %4103 = vmatprep.subr.bf16.mxu1 %v4957_v41 }
 0x7d1   : > { %3048 = vmatprep.mubr.f32.mxu0 %v5633_v57  ;;  %3119 = vmatprep.mubr.f32.mxu1 %v5633_v57 }
 0x7d3   : > { %4097 = vmatpush1.bf16.msra.mxu0 %v4950_v40  ;;  %4105 = vmatpush1.bf16.msra.mxu1 %v4967_v51 }
 0x7d6   : > { %3451 = vmatmul.mubr.msk.f32.vlgmr.msra.gmra.mrb[14].mxu0 %vm572_vm4, %v2834_v56  ;;  %3452 = vmatmul.mubr.msk.f32.vlgmr.msra.gmra.mrb[14].mxu1 %vm572_vm4, %v2834_v56 }
 0x8a9   : > { %v3050_v7 = vpop.f32.mrb[14].mxu0  ;;  %v3121_v15 = vpop.f32.mrb[14].mxu1 }
 0x8aa   : > { %v3126_v24 = vadd.f32 %v3050_v7, %v5054_v26  ;;  %v3052_v25 = vpop.f32.mrb[15].mxu0  ;;  %v3123_v35 = vpop.f32.mrb[15].mxu1  ;;  %v3128_v57 = vadd.f32 %v3121_v15, %v5063_v63 }
 0x8ab   : > { %v3127_v41 = vadd.f32 %v3052_v25, %v5056_v1  ;;  %v3129_v40 = vadd.f32 %v3123_v35, %v5060_v46 }
 0x8ac   : > { %v3453_v54 = vmul.f32 -1.442695, %v3126_v24 }
 0x8ad   : > { %v3454_v13 = vmul.f32 -1.442695, %v3127_v41  ;;  %v3455_v51 = vmul.f32 -1.442695, %v3129_v40 }
 0x8ae   : > { %4315 = vpow2.f32 %v3453_v54 }
 0x8af   : > { %4317 = vpow2.f32 %v3454_v13 }
 0x8b0   : > { %4319 = vpow2.f32 %v3455_v51 }
 0x8b1   : > { %4321 = vtanh.f32 %v3128_v57 }
 0x8b8   : > { %v4316_v60 = vpop.eup %4315 }
 0x8b9   : > { %v4318_v38 = vpop.eup %4317  ;;  %v3133_v48 = vadd.f32 1.0, %v4316_v60 }
 0x8ba   : > { %v3139_v26 = vadd.f32 1.0, %v4318_v38  ;;  %v4320_v1 = vpop.eup %4319 }
 0x8bb   : > { %4323 = vrcp.f32 %v3133_v48  ;;  %v4322_v34 = vpop.eup %4321  ;;  %v3146_v6 = vadd.f32 1.0, %v4320_v1 }
 0x8bc   : > { %4325 = vrcp.f32 %v3139_v26 }
 0x8bd   : > { %4327 = vrcp.f32 %v3146_v6 }
 0x8c5   : > { %v4324_v20 = vpop.eup %4323 }
 0x8c6   : > { %v4326_v46 = vpop.eup %4325  ;;  %v3150_v62 = vmul.f32 %v4324_v20, %v4322_v34 }
 0x8c7   : > { %v3149_v63 = vmul.f32 %v4326_v46, %v2819_v28  ;;  %v4328_v4 = vpop.eup %4327 }
 0x8c9   : > { %v3151_v30 = vadd.f32 %v3150_v62, %v3149_v63 }
 0x8cb   : > { %4329 = vtanh.f32 %v3151_v30 }
 0x8d5   : > { %v4330_v16 = vpop.eup %4329 }
 0x8d6   : > { %v3153_v0 = vmul.f32 %v4330_v16, %v4328_v4 }
 0x8d8   : > { %v3161_v8 = vsel %vm3159_vm0, %v3153_v0, %v5489_v50 }
 0x8d9   : > { %v3169_v55 = vmul.f32 %v3167_v43, %v3161_v8  ;;  %3173 = vst [vmem:[%s333_s13] sm:$0xff] %v3161_v8 }
 0x8da   : > { %4404 = shalt.err (!%p4401_p11)
}
 0x8db   : > { %s4405_s13 = scalar_lea.hbm %s5526_s25, 128  ;;  %s4409_s7 = scalar_lea.hbm %s5606_s6, 256 }
 0x8dc   : > { %p4406_p10 = scmp.ne.s32.totalorder %s5526_s25, %s4405_s13  ;;  %p4410_p4 = scmp.lt.u32.totalorder %s5526_s25, %s5606_s6 }
 0x8dd   : > { %p4411_p9 = scmp.lt.u32.totalorder %s4409_s7, %s4405_s13  ;;  %p4413_p3 = scmp.lt.u32.totalorder %s4405_s13, %s5526_s25 }
 0x8de   : > { %p4407_p7 = pnand %p4406_p10, %p5638_p0 }
 0x8df   : > { %p4412_p12 = por %p4411_p9, %p4410_p4 }
 0x8e0   : > { %p4408_p8 = pneg %p4407_p7 }
 0x8e1   : > { %p4414_p2 = por %p4413_p3, %p4412_p12 }
 0x8e3   : > { %p4415_p5 = pnand %p4414_p2, %p4408_p8 }
 0x8e5   : > { %4418 = shalt.err (!%p4415_p5)
}
 0x8e6   : > { %4143 = dma.vmem_to_hbm [thread:$0]  (%p5638_p0), %s5528_s8, 128, %s5526_s25, %s3180_s17   ;;  %3171 = vst [vmem:[%s3170_s20] sm:$0xff] %v3169_v55 }
 0x8e7   : > { %s3175_s26 = scalar_lea.sflag [#allocation6], %s4697_s18  ;;  %s4419_s11 = scalar_lea.vmem %s5531_s19, 1024 }
 0x8e8   : > { %p4420_p6 = scmp.ne.s32.totalorder %s5531_s19, %s4419_s11  ;;  %s4502_s13 = smov [#allocation9]  }
 0x8e9   : > { %s4423_s29 = sshll.u32 %s4502_s13, 4  ;;  %s4424_s29 = int_to_ptr.vmem [resolvable:$false] %s4423_s29 }
 0x8ea   : > { %p4421_p13 = pnand %p4420_p6, %p5638_p0  ;;  %s4425_s12 = scalar_lea.vmem %s4424_s29, 2048 }
 0x8eb   : > { %p4426_p11 = scmp.lt.s32.totalorder %s5531_s19, %s4424_s29  ;;  %p4427_p10 = scmp.lt.s32.totalorder %s4425_s12, %s4419_s11 }
 0x8ec   : > { %p4422_p1 = pneg %p4421_p13 }
 0x8ed   : > { %p4428_p7 = por %p4427_p10, %p4426_p11 }
 0x8ef   : > { %p4429_p8 = pnand %p4428_p7, %p4422_p1 }
 0x8f1   : > { %4432 = shalt.err (!%p4429_p8)
}
 0x8f2   : > { %s4433_s14 = scalar_lea.hbm %s5520_s28, 1024  ;;  %s4437_s8 = scalar_lea.hbm %s5605_s5, 2048 }
 0x8f3   : > { %p4434_p4 = scmp.ne.s32.totalorder %s5520_s28, %s4433_s14  ;;  %p4438_p3 = scmp.lt.u32.totalorder %s5520_s28, %s5605_s5 }
 0x8f4   : > { %p4439_p2 = scmp.lt.u32.totalorder %s4437_s8, %s4433_s14  ;;  %p4441_p6 = scmp.lt.u32.totalorder %s4433_s14, %s5520_s28 }
 0x8f5   : > { %p4435_p9 = pnand %p4434_p4, %p5638_p0 }
 0x8f6   : > { %p4440_p5 = por %p4439_p2, %p4438_p3 }
 0x8f7   : > { %p4436_p12 = pneg %p4435_p9 }
 0x8f8   : > { %p4442_p13 = por %p4441_p6, %p4440_p5 }
 0x8fa   : > { %p4443_p1 = pnand %p4442_p13, %p4436_p12 }
 0x8fc   : > { %4446 = shalt.err (!%p4443_p1)
}
 0x8fd   : > { %s4503_s7 = smov 128   ;;  %s4504_s16 = smov 256  }
 0x8fe   : > { %s4505_s15 = smov 8  }
 0x8ff   : > { %4142 = dma.vmem_to_hbm [thread:$0]  (%p5638_p0), %s5531_s19, 1024, %s5520_s28, %s3175_s26, %s4503_s7, %s4504_s16, %s4505_s15  }
 0x900 PF: > { %s3220_s11 = sand.u32 1, %s4481_s21   ;;  %p5639_p11 = scmp.ne.s32.totalorder %s5616_s10, 0 }
 0x901   : > { %p5640_p10 = scmp.ge.s32.totalorder %s4493_s24, 2  ;;  %s3221_s13 = scalar_lea.sflag [#allocation6], %s3220_s11 }
 0x903   : > { %p4154_p7 = pnand %p5640_p10, %p5639_p11 }
 0x905   : > { %4472 = dma.done.wait (!%p4154_p7), %s3221_s13, 1024  }
 0x906   : > { %4474 = vsyncadd (!%p4154_p7), %s3221_s13, 4294966272  ;;  %s3230_s29 = scalar_lea.sflag [#allocation11], %s3220_s11 }
 0x907   : > { %4476 = dma.done.wait (!%p4154_p7), %s3230_s29, 128  }
 0x908   : > { %4478 = vsyncadd (!%p4154_p7), %s3230_s29, 4294967168  ;;  %p26_p0 = scmp.ge.s32.totalorder %s4566_s27, 4   ;;  %s5641_s21 = smov %s4485_s22 }
 0x909   : > { %s5642_s22 = smov %s4489_s23  ;;  %s5643_s23 = smov %s4578_s30 }
 0x90a   : > { %s5644_s24 = smov %s4566_s27  ;;  %28 = sbr.rel (!%p26_p0) target bundleno = 11 (0xb), region = 142 }
 0x911   :  { %3235 = vsyncpa [#allocation5], 1 }
 0x912   :  { %3237 = vsyncpa [#allocation5 + $0x1], 1 }
 0x913   :  { %3238 = vsyncpa [#allocation8], 1 }
 0x914   :  { %3240 = vsyncpa [#allocation8 + $0x1], 1 }
 0x915   :  { %3241 = vsyncpa [#allocation6], 1 }
 0x916   :  { %3243 = vsyncpa [#allocation6 + $0x1], 1 }
 0x917   :  { %3244 = vsyncpa [#allocation11], 1 }
 0x918   :  { %3246 = vsyncpa [#allocation11 + $0x1], 1 }

</bundles_post_ra>
